<compile_context>
chip_gen: v6e
topology: v6e:2x2x1
jax: 0.10.0
libtpu: 0.0.40
codegen_flags: <defaults>
</compile_context>

<pallas_src>
import functools
import math

import jax
import jax.numpy as jnp
from jax.experimental import pallas as pl
from jax.experimental.pallas import tpu as pltpu


# ---------------------------------------------------------------------------
# Shared helpers (in-kernel)
# ---------------------------------------------------------------------------

def _compiler_params():
    return pltpu.CompilerParams(
        dimension_semantics=("parallel",),
        vmem_limit_bytes=64 * 1024 * 1024,
    )


def _softmax(x, axis):
    m = jnp.max(x, axis=axis, keepdims=True)
    e = jnp.exp(x - m)
    # multiply by reciprocal instead of dividing (EUP slot).
    return e * pl.reciprocal(jnp.sum(e, axis=axis, keepdims=True))


def _layernorm(s, g, b, eps):
    mean = jnp.mean(s)
    var = jnp.mean((s - mean) * (s - mean))
    inv = jax.lax.rsqrt(var + eps)
    return (s - mean) * inv * g + b


def _fill_patches(x2d, pad_ref, patch_ref, cin, H, W):
    """im2col slab for a 3x3 / pad=1 / stride=1 conv.

    x2d:       (cin, H*W) value (flattened spatial).
    pad_ref:   (cin, H+2, W+2) VMEM scratch; zero halo built in-kernel.
    patch_ref: (9*cin, H*W) VMEM scratch, tap-major: row t*cin + c holds
               x[c, y+ky, x+kx] for tap t = ky*3 + kx.
    """
    HW = H * W
    pad_ref[...] = jnp.zeros_like(pad_ref)
    pad_ref[:, 1:H + 1, 1:W + 1] = x2d.reshape(cin, H, W)
    for ky in range(3):
        for kx in range(3):
            t = ky * 3 + kx
            win = pad_ref[:, ky:ky + H, kx:kx + W].reshape(cin, HW)
            patch_ref[t * cin:(t + 1) * cin, :] = win.astype(patch_ref.dtype)


# ---------------------------------------------------------------------------
# Kernels
# ---------------------------------------------------------------------------

def _qkvr_kernel(x_ref, wq_ref, wk_ref, wv_ref, wr_ref,
                 bq_ref, bk_ref, bv_ref, br_ref,
                 q_out, k_out, v_out, r_out,
                 pad_ref, patch_ref, *, C, H, W):
    # x_ref: (1, C, H*W); weights: wq (E, C), wk/wv/wr (E, 9*C); biases (E, 1).
    x = x_ref[0]                                            # (C, H*W) f32

    # 1x1 conv (Q): plain channel matmul, no halo needed.
    q_out[0] = (jnp.dot(wq_ref[...], x.astype(wq_ref.dtype),
                        preferred_element_type=jnp.float32) + bq_ref[...])

    # Shared im2col slab, then one depth-(9*C) MXU dot per 3x3 conv.
    _fill_patches(x, pad_ref, patch_ref, C, H, W)
    p = patch_ref[...]
    k_out[0] = (jnp.dot(wk_ref[...], p, preferred_element_type=jnp.float32)
                + bk_ref[...])
    v_out[0] = (jnp.dot(wv_ref[...], p, preferred_element_type=jnp.float32)
                + bv_ref[...])
    r_out[0] = (jnp.dot(wr_ref[...], p, preferred_element_type=jnp.float32)
                + br_ref[...])


def _attn_ln_kernel(q_ref, k_ref, v_ref, r_ref, g_ref, beta_ref, o_ref,
                    *, E, H, W, inv_scaler, eps, mdt):
    # All data refs: (1, E, H*W); g/beta: (E, H*W).
    HW = H * W
    q = q_ref[0].reshape(E, H, W).astype(mdt)
    k = k_ref[0].reshape(E, H, W).astype(mdt)
    v = v_ref[0].reshape(E, H, W)

    # scores[e,h,h'] = sum_w q[e,h,w] * k[e,h',w]   (== Q @ K^T, no transpose)
    scores = jax.lax.dot_general(
        q, k, (((2,), (2,)), ((0,), (0,))),
        preferred_element_type=jnp.float32) * inv_scaler
    temp1 = _softmax(scores, axis=-1)                       # (E, H, H)

    # s2[e,w,w'] = sum_h q[e,h,w] * k[e,h,w']       (== Q^T @ K, no transpose)
    s2 = jax.lax.dot_general(
        q, k, (((1,), (1,)), ((0,), (0,))),
        preferred_element_type=jnp.float32) * inv_scaler
    temp2 = _softmax(s2, axis=-2)                           # (E, W, W)

    tv = jax.lax.dot_general(
        temp1.astype(mdt), v.astype(mdt), (((2,), (1,)), ((0,), (0,))),
        preferred_element_type=jnp.float32)                 # (E, H, W)
    attn = jax.lax.dot_general(
        tv.astype(mdt), temp2.astype(mdt), (((2,), (1,)), ((0,), (0,))),
        preferred_element_type=jnp.float32)                 # (E, H, W)

    # fused residual add + LayerNorm over (E, H, W)
    s = attn.reshape(E, HW) + r_ref[0]
    o_ref[0] = _layernorm(s, g_ref[...], beta_ref[...], eps)


def _lin_ln_kernel(z_ref, w_ref, b_ref, g_ref, beta_ref, o_ref,
                   pad_ref, patch_ref, *, E, H, W, eps):
    # z_ref: (1, E, H*W); w_ref: (E, 9*E); b_ref: (E, 1); g/beta: (E, H*W).
    z = z_ref[0]                                            # (E, H*W)
    _fill_patches(z, pad_ref, patch_ref, E, H, W)
    z2 = (jnp.dot(w_ref[...], patch_ref[...],
                  preferred_element_type=jnp.float32) + b_ref[...])
    z2 = jnp.maximum(z2, 0.0)                               # ReLU; dropout = id
    s = z + z2
    o_ref[0] = _layernorm(s, g_ref[...], beta_ref[...], eps)


# ---------------------------------------------------------------------------
# Pallas-call wrappers
# ---------------------------------------------------------------------------

def _tap_major(w):
    """(E, Cin, 3, 3) OIHW -> (E, 9*Cin) tap-major, matching _fill_patches."""
    E, Cin, K, _ = w.shape
    return jnp.transpose(w, (0, 2, 3, 1)).reshape(E, K * K * Cin)


def fused_qkvr_conv(x_flat, p, *, C, E, H, W, mdt):
    """One pallas_call producing Q (1x1 conv), K, V, residual (3x3 convs)."""
    B = x_flat.shape[0]
    HW = H * W
    wq = p["wq_w"].reshape(E, C).astype(mdt)
    wk = _tap_major(p["wk_w"]).astype(mdt)
    wv = _tap_major(p["wv_w"]).astype(mdt)
    wr = _tap_major(p["res_w"]).astype(mdt)
    bq = p["wq_b"].reshape(E, 1)
    bk = p["wk_b"].reshape(E, 1)
    bv = p["wv_b"].reshape(E, 1)
    br = p["res_b"].reshape(E, 1)

    x_spec = pl.BlockSpec((1, C, HW), lambda i: (i, 0, 0))
    out_spec = pl.BlockSpec((1, E, HW), lambda i: (i, 0, 0))
    wq_spec = pl.BlockSpec((E, C), lambda i: (0, 0))
    w3_spec = pl.BlockSpec((E, 9 * C), lambda i: (0, 0))
    b_spec = pl.BlockSpec((E, 1), lambda i: (0, 0))

    kernel = functools.partial(_qkvr_kernel, C=C, H=H, W=W)
    out_sds = jax.ShapeDtypeStruct((B, E, HW), jnp.float32)
    return pl.pallas_call(
        kernel,
        out_shape=(out_sds, out_sds, out_sds, out_sds),
        grid=(B,),
        in_specs=[x_spec, wq_spec, w3_spec, w3_spec, w3_spec,
                  b_spec, b_spec, b_spec, b_spec],
        out_specs=(out_spec, out_spec, out_spec, out_spec),
        scratch_shapes=[
            pltpu.VMEM((C, H + 2, W + 2), jnp.float32),
            pltpu.VMEM((9 * C, HW), mdt),
        ],
        compiler_params=_compiler_params(),
    )(x_flat, wq, wk, wv, wr, bq, bk, bv, br)


def attention_ln(q, k, v, r, gamma, beta, *, E, H, W, scaler, eps, mdt):
    """Attention (batched over E) + residual add + LayerNorm1, per batch."""
    B = q.shape[0]
    HW = H * W
    bspec = pl.BlockSpec((1, E, HW), lambda i: (i, 0, 0))
    fspec = pl.BlockSpec((E, HW), lambda i: (0, 0))
    kernel = functools.partial(_attn_ln_kernel, E=E, H=H, W=W,
                               inv_scaler=1.0 / scaler, eps=eps, mdt=mdt)
    return pl.pallas_call(
        kernel,
        out_shape=jax.ShapeDtypeStruct((B, E, HW), jnp.float32),
        grid=(B,),
        in_specs=[bspec, bspec, bspec, bspec, fspec, fspec],
        out_specs=bspec,
        compiler_params=_compiler_params(),
    )(q, k, v, r, gamma, beta)


def linear_ln(z, w_taps, b, gamma, beta, *, E, H, W, eps, mdt):
    """3x3 conv + ReLU + residual add + LayerNorm2, per batch."""
    B = z.shape[0]
    HW = H * W
    bspec = pl.BlockSpec((1, E, HW), lambda i: (i, 0, 0))
    fspec = pl.BlockSpec((E, HW), lambda i: (0, 0))
    w_spec = pl.BlockSpec((E, 9 * E), lambda i: (0, 0))
    b_spec = pl.BlockSpec((E, 1), lambda i: (0, 0))
    kernel = functools.partial(_lin_ln_kernel, E=E, H=H, W=W, eps=eps)
    return pl.pallas_call(
        kernel,
        out_shape=jax.ShapeDtypeStruct((B, E, HW), jnp.float32),
        grid=(B,),
        in_specs=[bspec, w_spec, b_spec, fspec, fspec],
        out_specs=bspec,
        scratch_shapes=[
            pltpu.VMEM((E, H + 2, W + 2), jnp.float32),
            pltpu.VMEM((9 * E, HW), mdt),
        ],
        compiler_params=_compiler_params(),
    )(z, w_taps.astype(mdt), b, gamma, beta)


# ---------------------------------------------------------------------------
# encoder forward (eval mode: Dropout / Dropout2d are identity)
# ---------------------------------------------------------------------------

def encoder_forward(x, p, *, enc_dim, matmul_dtype=jnp.float32):
    """Forward pass of the PyTorch `encoder` module (inference mode).

    Set matmul_dtype=jnp.bfloat16 to feed the MXU bf16 operands (~2x MXU
    throughput, f32 accumulation) at a small precision cost; the default f32
    preserves the PyTorch fp32 numerics.
    """
    B, C, H, W = x.shape
    E = enc_dim
    HW = H * W
    scaler = math.sqrt(enc_dim)

    x_flat = x.reshape(B, C, HW)                      # lane-dense HBM layout

    q, k, v, r = fused_qkvr_conv(x_flat, p, C=C, E=E, H=H, W=W,
                                 mdt=matmul_dtype)

    z = attention_ln(q, k, v, r,
                     p["ln1_g"].reshape(E, HW), p["ln1_b"].reshape(E, HW),
                     E=E, H=H, W=W, scaler=scaler, eps=1e-5, mdt=matmul_dtype)

    out = linear_ln(z, _tap_major(p["lin_w"]), p["lin_b"].reshape(E, 1),
                    p["ln2_g"].reshape(E, HW), p["ln2_b"].reshape(E, HW),
                    E=E, H=H, W=W, eps=1e-5, mdt=matmul_dtype)

    return out.reshape(B, E, H, W)


# ---------------------------------------------------------------------------
# Pure-JAX reference (for verification)
# ---------------------------------------------------------------------------

def _ref_conv(x, w, b, pad, relu=False):
    out = jax.lax.conv_general_dilated(
        x, w, (1, 1), [(pad, pad), (pad, pad)],
        dimension_numbers=("NCHW", "OIHW", "NCHW"))
    out = out + b[None, :, None, None]
    return jnp.maximum(out, 0.0) if relu else out


def _ref_ln(s, g, b, eps=1e-5):
    mean = jnp.mean(s, axis=(1, 2, 3), keepdims=True)
    var = jnp.mean((s - mean) ** 2, axis=(1, 2, 3), keepdims=True)
    return (s - mean) / jnp.sqrt(var + eps) * g[None] + b[None]


def encoder_reference(x, p, *, enc_dim):
    scaler = math.sqrt(enc_dim)
    q = _ref_conv(x, p["wq_w"], p["wq_b"], 0)
    k = _ref_conv(x, p["wk_w"], p["wk_b"], 1)
    v = _ref_conv(x, p["wv_w"], p["wv_b"], 1)
    scores = jnp.einsum("behw,bekw->behk", q, k) / scaler
    temp1 = jax.nn.softmax(scores, axis=-1)
    s2 = jnp.einsum("behw,behv->bewv", q, k) / scaler
    temp2 = jax.nn.softmax(s2, axis=-2)
    z = jnp.einsum("behk,bekw,bewv->behv", temp1, v, temp2)
    r = _ref_conv(x, p["res_w"], p["res_b"], 1)
    z = _ref_ln(z + r, p["ln1_g"], p["ln1_b"])
    z2 = _ref_conv(z, p["lin_w"], p["lin_b"], 1, relu=True)
    return _ref_ln(z + z2, p["ln2_g"], p["ln2_b"])


# ---------------------------------------------------------------------------
# main
# ---------------------------------------------------------------------------

if __name__ == "__main__":
    B, DIM, ENC, H, W = 2, 4, 8, 16, 16

    key = jax.random.PRNGKey(0)
    ks = jax.random.split(key, 11)

    def nrm(k, shape, scale=0.1):
        return scale * jax.random.normal(k, shape, dtype=jnp.float32)

    params = {
        "wq_w": nrm(ks[0], (ENC, DIM, 1, 1)), "wq_b": nrm(ks[1], (ENC,)),
        "wk_w": nrm(ks[2], (ENC, DIM, 3, 3)), "wk_b": nrm(ks[3], (ENC,)),
        "wv_w": nrm(ks[4], (ENC, DIM, 3, 3)), "wv_b": nrm(ks[5], (ENC,)),
        "res_w": nrm(ks[6], (ENC, DIM, 3, 3)), "res_b": nrm(ks[7], (ENC,)),
        "lin_w": nrm(ks[8], (ENC, ENC, 3, 3)), "lin_b": nrm(ks[9], (ENC,)),
        # LayerNorm affine params: PyTorch default init (ones / zeros)
        "ln1_g": jnp.ones((ENC, H, W), jnp.float32),
        "ln1_b": jnp.zeros((ENC, H, W), jnp.float32),
        "ln2_g": jnp.ones((ENC, H, W), jnp.float32),
        "ln2_b": jnp.zeros((ENC, H, W), jnp.float32),
    }

    x = jax.random.normal(ks[10], (B, DIM, H, W), dtype=jnp.float32)

    out = encoder_forward(x, params, enc_dim=ENC)
    out = jax.block_until_ready(out)

    ref = jax.block_until_ready(encoder_reference(x, params, enc_dim=ENC))
    assert out.shape == (B, ENC, H, W)
    assert jnp.allclose(out, ref, rtol=2e-4, atol=2e-4), \
        f"max abs diff {jnp.max(jnp.abs(out - ref))}"

    print("KERNEL_OK")
</pallas_src>

<mosaic_0001>
module attributes {stable_mosaic.version = 11 : i64} {
  func.func @_qkvr_kernel(%arg0: i32, %arg1: memref<1x4x256xf32, #tpu.memory_space<vmem>>, %arg2: memref<8x4xf32, #tpu.memory_space<vmem>>, %arg3: memref<8x36xf32, #tpu.memory_space<vmem>>, %arg4: memref<8x36xf32, #tpu.memory_space<vmem>>, %arg5: memref<8x36xf32, #tpu.memory_space<vmem>>, %arg6: memref<8x1xf32, #tpu.memory_space<vmem>>, %arg7: memref<8x1xf32, #tpu.memory_space<vmem>>, %arg8: memref<8x1xf32, #tpu.memory_space<vmem>>, %arg9: memref<8x1xf32, #tpu.memory_space<vmem>>, %arg10: memref<1x8x256xf32, #tpu.memory_space<vmem>>, %arg11: memref<1x8x256xf32, #tpu.memory_space<vmem>>, %arg12: memref<1x8x256xf32, #tpu.memory_space<vmem>>, %arg13: memref<1x8x256xf32, #tpu.memory_space<vmem>>, %arg14: memref<4x18x18xf32, #tpu.memory_space<vmem>>, %arg15: memref<36x256xf32, #tpu.memory_space<vmem>>) attributes {dimension_semantics = [#tpu.dimension_semantics<parallel>], iteration_bounds = array<i64: 2>, scalar_prefetch = 0 : i64, scratch_operands = 2 : i64, tpu.core_type = #tpu.core_type<tc>, window_params = [{transform_indices = @transform_0, window_bounds = array<i64: 1, 4, 256>}, {pipeline_mode = #tpu.pipeline_mode<synchronous>, transform_indices = @transform_1, window_bounds = array<i64: 8, 4>}, {pipeline_mode = #tpu.pipeline_mode<synchronous>, transform_indices = @transform_2, window_bounds = array<i64: 8, 36>}, {pipeline_mode = #tpu.pipeline_mode<synchronous>, transform_indices = @transform_3, window_bounds = array<i64: 8, 36>}, {pipeline_mode = #tpu.pipeline_mode<synchronous>, transform_indices = @transform_4, window_bounds = array<i64: 8, 36>}, {pipeline_mode = #tpu.pipeline_mode<synchronous>, transform_indices = @transform_5, window_bounds = array<i64: 8, 1>}, {pipeline_mode = #tpu.pipeline_mode<synchronous>, transform_indices = @transform_6, window_bounds = array<i64: 8, 1>}, {pipeline_mode = #tpu.pipeline_mode<synchronous>, transform_indices = @transform_7, window_bounds = array<i64: 8, 1>}, {pipeline_mode = #tpu.pipeline_mode<synchronous>, transform_indices = @transform_8, window_bounds = array<i64: 8, 1>}, {transform_indices = @transform_9, window_bounds = array<i64: 1, 8, 256>}, {transform_indices = @transform_10, window_bounds = array<i64: 1, 8, 256>}, {transform_indices = @transform_11, window_bounds = array<i64: 1, 8, 256>}, {transform_indices = @transform_12, window_bounds = array<i64: 1, 8, 256>}]} {
    %c0 = arith.constant 0 : index
    %c0_0 = arith.constant 0 : index
    %c0_1 = arith.constant 0 : index
    %0 = vector.load %arg1[%c0, %c0_0, %c0_1] : memref<1x4x256xf32, #tpu.memory_space<vmem>>, vector<1x4x256xf32>
    %1 = vector.shape_cast %0 : vector<1x4x256xf32> to vector<4x256xf32>
    %c0_2 = arith.constant 0 : index
    %c0_3 = arith.constant 0 : index
    %2 = vector.load %arg2[%c0_2, %c0_3] : memref<8x4xf32, #tpu.memory_space<vmem>>, vector<8x4xf32>
    %cst = arith.constant dense<0.000000e+00> : vector<8x256xf32>
    %3 = tpu.matmul %2, %1, %cst {dimension_numbers = #tpu.dot_dimension_numbers<[1], [0], [0], [1], [0, 0, 1, 1], [], []>} : vector<8x4xf32>, vector<4x256xf32>, vector<8x256xf32> -> vector<8x256xf32>
    %c0_4 = arith.constant 0 : index
    %c0_5 = arith.constant 0 : index
    %4 = vector.load %arg6[%c0_4, %c0_5] : memref<8x1xf32, #tpu.memory_space<vmem>>, vector<8x1xf32>
    %5 = vector.broadcast %4 : vector<8x1xf32> to vector<8x256xf32>
    %6 = arith.addf %3, %5 : vector<8x256xf32>
    %c0_6 = arith.constant 0 : index
    %c0_7 = arith.constant 0 : index
    %c0_8 = arith.constant 0 : index
    %7 = vector.load %arg10[%c0_6, %c0_7, %c0_8] : memref<1x8x256xf32, #tpu.memory_space<vmem>>, vector<1x8x256xf32>
    %8 = vector.shape_cast %7 : vector<1x8x256xf32> to vector<8x256xf32>
    %9 = vector.shape_cast %6 : vector<8x256xf32> to vector<1x8x256xf32>
    tpu.vector_store %arg10[%c0_6, %c0_7, %c0_8], %9 {strides = array<i32>} : memref<1x8x256xf32, #tpu.memory_space<vmem>>, vector<1x8x256xf32>,
    %cst_9 = arith.constant 0.000000e+00 : f32
    %10 = vector.broadcast %cst_9 : f32 to vector<4x18x18xf32>
    %c0_10 = arith.constant 0 : index
    %c0_11 = arith.constant 0 : index
    %c0_12 = arith.constant 0 : index
    %11 = vector.load %arg14[%c0_10, %c0_11, %c0_12] : memref<4x18x18xf32, #tpu.memory_space<vmem>>, vector<4x18x18xf32>
    tpu.vector_store %arg14[%c0_10, %c0_11, %c0_12], %10 {strides = array<i32>} : memref<4x18x18xf32, #tpu.memory_space<vmem>>, vector<4x18x18xf32>,
    %12 = vector.shape_cast %1 : vector<4x256xf32> to vector<4x16x16xf32>
    %c0_13 = arith.constant 0 : index
    %c1 = arith.constant 1 : index
    %c1_14 = arith.constant 1 : index
    %13 = vector.load %arg14[%c0_13, %c1, %c1_14] : memref<4x18x18xf32, #tpu.memory_space<vmem>>, vector<4x16x16xf32>
    tpu.vector_store %arg14[%c0_13, %c1, %c1_14], %12 {strides = array<i32>} : memref<4x18x18xf32, #tpu.memory_space<vmem>>, vector<4x16x16xf32>,
    %c0_15 = arith.constant 0 : index
    %c0_16 = arith.constant 0 : index
    %c0_17 = arith.constant 0 : index
    %14 = vector.load %arg14[%c0_15, %c0_16, %c0_17] : memref<4x18x18xf32, #tpu.memory_space<vmem>>, vector<4x16x16xf32>
    %15 = vector.shape_cast %14 : vector<4x16x16xf32> to vector<4x256xf32>
    %c0_18 = arith.constant 0 : index
    %c0_19 = arith.constant 0 : index
    %16 = vector.load %arg15[%c0_18, %c0_19] : memref<36x256xf32, #tpu.memory_space<vmem>>, vector<4x256xf32>
    tpu.vector_store %arg15[%c0_18, %c0_19], %15 {strides = array<i32>} : memref<36x256xf32, #tpu.memory_space<vmem>>, vector<4x256xf32>,
    %c0_20 = arith.constant 0 : index
    %c0_21 = arith.constant 0 : index
    %c1_22 = arith.constant 1 : index
    %17 = vector.load %arg14[%c0_20, %c0_21, %c1_22] : memref<4x18x18xf32, #tpu.memory_space<vmem>>, vector<4x16x16xf32>
    %18 = vector.shape_cast %17 : vector<4x16x16xf32> to vector<4x256xf32>
    %c4 = arith.constant 4 : index
    %c0_23 = arith.constant 0 : index
    %19 = vector.load %arg15[%c4, %c0_23] : memref<36x256xf32, #tpu.memory_space<vmem>>, vector<4x256xf32>
    tpu.vector_store %arg15[%c4, %c0_23], %18 {strides = array<i32>} : memref<36x256xf32, #tpu.memory_space<vmem>>, vector<4x256xf32>,
    %c0_24 = arith.constant 0 : index
    %c0_25 = arith.constant 0 : index
    %c2 = arith.constant 2 : index
    %20 = vector.load %arg14[%c0_24, %c0_25, %c2] : memref<4x18x18xf32, #tpu.memory_space<vmem>>, vector<4x16x16xf32>
    %21 = vector.shape_cast %20 : vector<4x16x16xf32> to vector<4x256xf32>
    %c8 = arith.constant 8 : index
    %c0_26 = arith.constant 0 : index
    %22 = vector.load %arg15[%c8, %c0_26] : memref<36x256xf32, #tpu.memory_space<vmem>>, vector<4x256xf32>
    tpu.vector_store %arg15[%c8, %c0_26], %21 {strides = array<i32>} : memref<36x256xf32, #tpu.memory_space<vmem>>, vector<4x256xf32>,
    %c0_27 = arith.constant 0 : index
    %c1_28 = arith.constant 1 : index
    %c0_29 = arith.constant 0 : index
    %23 = vector.load %arg14[%c0_27, %c1_28, %c0_29] : memref<4x18x18xf32, #tpu.memory_space<vmem>>, vector<4x16x16xf32>
    %24 = vector.shape_cast %23 : vector<4x16x16xf32> to vector<4x256xf32>
    %c12 = arith.constant 12 : index
    %c0_30 = arith.constant 0 : index
    %25 = vector.load %arg15[%c12, %c0_30] : memref<36x256xf32, #tpu.memory_space<vmem>>, vector<4x256xf32>
    tpu.vector_store %arg15[%c12, %c0_30], %24 {strides = array<i32>} : memref<36x256xf32, #tpu.memory_space<vmem>>, vector<4x256xf32>,
    %c0_31 = arith.constant 0 : index
    %c1_32 = arith.constant 1 : index
    %c1_33 = arith.constant 1 : index
    %26 = vector.load %arg14[%c0_31, %c1_32, %c1_33] : memref<4x18x18xf32, #tpu.memory_space<vmem>>, vector<4x16x16xf32>
    %27 = vector.shape_cast %26 : vector<4x16x16xf32> to vector<4x256xf32>
    %c16 = arith.constant 16 : index
    %c0_34 = arith.constant 0 : index
    %28 = vector.load %arg15[%c16, %c0_34] : memref<36x256xf32, #tpu.memory_space<vmem>>, vector<4x256xf32>
    tpu.vector_store %arg15[%c16, %c0_34], %27 {strides = array<i32>} : memref<36x256xf32, #tpu.memory_space<vmem>>, vector<4x256xf32>,
    %c0_35 = arith.constant 0 : index
    %c1_36 = arith.constant 1 : index
    %c2_37 = arith.constant 2 : index
    %29 = vector.load %arg14[%c0_35, %c1_36, %c2_37] : memref<4x18x18xf32, #tpu.memory_space<vmem>>, vector<4x16x16xf32>
    %30 = vector.shape_cast %29 : vector<4x16x16xf32> to vector<4x256xf32>
    %c20 = arith.constant 20 : index
    %c0_38 = arith.constant 0 : index
    %31 = vector.load %arg15[%c20, %c0_38] : memref<36x256xf32, #tpu.memory_space<vmem>>, vector<4x256xf32>
    tpu.vector_store %arg15[%c20, %c0_38], %30 {strides = array<i32>} : memref<36x256xf32, #tpu.memory_space<vmem>>, vector<4x256xf32>,
    %c0_39 = arith.constant 0 : index
    %c2_40 = arith.constant 2 : index
    %c0_41 = arith.constant 0 : index
    %32 = vector.load %arg14[%c0_39, %c2_40, %c0_41] : memref<4x18x18xf32, #tpu.memory_space<vmem>>, vector<4x16x16xf32>
    %33 = vector.shape_cast %32 : vector<4x16x16xf32> to vector<4x256xf32>
    %c24 = arith.constant 24 : index
    %c0_42 = arith.constant 0 : index
    %34 = vector.load %arg15[%c24, %c0_42] : memref<36x256xf32, #tpu.memory_space<vmem>>, vector<4x256xf32>
    tpu.vector_store %arg15[%c24, %c0_42], %33 {strides = array<i32>} : memref<36x256xf32, #tpu.memory_space<vmem>>, vector<4x256xf32>,
    %c0_43 = arith.constant 0 : index
    %c2_44 = arith.constant 2 : index
    %c1_45 = arith.constant 1 : index
    %35 = vector.load %arg14[%c0_43, %c2_44, %c1_45] : memref<4x18x18xf32, #tpu.memory_space<vmem>>, vector<4x16x16xf32>
    %36 = vector.shape_cast %35 : vector<4x16x16xf32> to vector<4x256xf32>
    %c28 = arith.constant 28 : index
    %c0_46 = arith.constant 0 : index
    %37 = vector.load %arg15[%c28, %c0_46] : memref<36x256xf32, #tpu.memory_space<vmem>>, vector<4x256xf32>
    tpu.vector_store %arg15[%c28, %c0_46], %36 {strides = array<i32>} : memref<36x256xf32, #tpu.memory_space<vmem>>, vector<4x256xf32>,
    %c0_47 = arith.constant 0 : index
    %c2_48 = arith.constant 2 : index
    %c2_49 = arith.constant 2 : index
    %38 = vector.load %arg14[%c0_47, %c2_48, %c2_49] : memref<4x18x18xf32, #tpu.memory_space<vmem>>, vector<4x16x16xf32>
    %39 = vector.shape_cast %38 : vector<4x16x16xf32> to vector<4x256xf32>
    %c32 = arith.constant 32 : index
    %c0_50 = arith.constant 0 : index
    %40 = vector.load %arg15[%c32, %c0_50] : memref<36x256xf32, #tpu.memory_space<vmem>>, vector<4x256xf32>
    tpu.vector_store %arg15[%c32, %c0_50], %39 {strides = array<i32>} : memref<36x256xf32, #tpu.memory_space<vmem>>, vector<4x256xf32>,
    %c0_51 = arith.constant 0 : index
    %c0_52 = arith.constant 0 : index
    %41 = vector.load %arg15[%c0_51, %c0_52] : memref<36x256xf32, #tpu.memory_space<vmem>>, vector<36x256xf32>
    %c0_53 = arith.constant 0 : index
    %c0_54 = arith.constant 0 : index
    %42 = vector.load %arg3[%c0_53, %c0_54] : memref<8x36xf32, #tpu.memory_space<vmem>>, vector<8x36xf32>
    %cst_55 = arith.constant dense<0.000000e+00> : vector<8x256xf32>
    %43 = tpu.matmul %42, %41, %cst_55 {dimension_numbers = #tpu.dot_dimension_numbers<[1], [0], [0], [1], [0, 0, 1, 1], [], []>} : vector<8x36xf32>, vector<36x256xf32>, vector<8x256xf32> -> vector<8x256xf32>
    %c0_56 = arith.constant 0 : index
    %c0_57 = arith.constant 0 : index
    %44 = vector.load %arg7[%c0_56, %c0_57] : memref<8x1xf32, #tpu.memory_space<vmem>>, vector<8x1xf32>
    %45 = vector.broadcast %44 : vector<8x1xf32> to vector<8x256xf32>
    %46 = arith.addf %43, %45 : vector<8x256xf32>
    %c0_58 = arith.constant 0 : index
    %c0_59 = arith.constant 0 : index
    %c0_60 = arith.constant 0 : index
    %47 = vector.load %arg11[%c0_58, %c0_59, %c0_60] : memref<1x8x256xf32, #tpu.memory_space<vmem>>, vector<1x8x256xf32>
    %48 = vector.shape_cast %47 : vector<1x8x256xf32> to vector<8x256xf32>
    %49 = vector.shape_cast %46 : vector<8x256xf32> to vector<1x8x256xf32>
    tpu.vector_store %arg11[%c0_58, %c0_59, %c0_60], %49 {strides = array<i32>} : memref<1x8x256xf32, #tpu.memory_space<vmem>>, vector<1x8x256xf32>,
    %c0_61 = arith.constant 0 : index
    %c0_62 = arith.constant 0 : index
    %50 = vector.load %arg4[%c0_61, %c0_62] : memref<8x36xf32, #tpu.memory_space<vmem>>, vector<8x36xf32>
    %cst_63 = arith.constant dense<0.000000e+00> : vector<8x256xf32>
    %51 = tpu.matmul %50, %41, %cst_63 {dimension_numbers = #tpu.dot_dimension_numbers<[1], [0], [0], [1], [0, 0, 1, 1], [], []>} : vector<8x36xf32>, vector<36x256xf32>, vector<8x256xf32> -> vector<8x256xf32>
    %c0_64 = arith.constant 0 : index
    %c0_65 = arith.constant 0 : index
    %52 = vector.load %arg8[%c0_64, %c0_65] : memref<8x1xf32, #tpu.memory_space<vmem>>, vector<8x1xf32>
    %53 = vector.broadcast %52 : vector<8x1xf32> to vector<8x256xf32>
    %54 = arith.addf %51, %53 : vector<8x256xf32>
    %c0_66 = arith.constant 0 : index
    %c0_67 = arith.constant 0 : index
    %c0_68 = arith.constant 0 : index
    %55 = vector.load %arg12[%c0_66, %c0_67, %c0_68] : memref<1x8x256xf32, #tpu.memory_space<vmem>>, vector<1x8x256xf32>
    %56 = vector.shape_cast %55 : vector<1x8x256xf32> to vector<8x256xf32>
    %57 = vector.shape_cast %54 : vector<8x256xf32> to vector<1x8x256xf32>
    tpu.vector_store %arg12[%c0_66, %c0_67, %c0_68], %57 {strides = array<i32>} : memref<1x8x256xf32, #tpu.memory_space<vmem>>, vector<1x8x256xf32>,
    %c0_69 = arith.constant 0 : index
    %c0_70 = arith.constant 0 : index
    %58 = vector.load %arg5[%c0_69, %c0_70] : memref<8x36xf32, #tpu.memory_space<vmem>>, vector<8x36xf32>
    %cst_71 = arith.constant dense<0.000000e+00> : vector<8x256xf32>
    %59 = tpu.matmul %58, %41, %cst_71 {dimension_numbers = #tpu.dot_dimension_numbers<[1], [0], [0], [1], [0, 0, 1, 1], [], []>} : vector<8x36xf32>, vector<36x256xf32>, vector<8x256xf32> -> vector<8x256xf32>
    %c0_72 = arith.constant 0 : index
    %c0_73 = arith.constant 0 : index
    %60 = vector.load %arg9[%c0_72, %c0_73] : memref<8x1xf32, #tpu.memory_space<vmem>>, vector<8x1xf32>
    %61 = vector.broadcast %60 : vector<8x1xf32> to vector<8x256xf32>
    %62 = arith.addf %59, %61 : vector<8x256xf32>
    %c0_74 = arith.constant 0 : index
    %c0_75 = arith.constant 0 : index
    %c0_76 = arith.constant 0 : index
    %63 = vector.load %arg13[%c0_74, %c0_75, %c0_76] : memref<1x8x256xf32, #tpu.memory_space<vmem>>, vector<1x8x256xf32>
    %64 = vector.shape_cast %63 : vector<1x8x256xf32> to vector<8x256xf32>
    %65 = vector.shape_cast %62 : vector<8x256xf32> to vector<1x8x256xf32>
    tpu.vector_store %arg13[%c0_74, %c0_75, %c0_76], %65 {strides = array<i32>} : memref<1x8x256xf32, #tpu.memory_space<vmem>>, vector<1x8x256xf32>,
    return
  }
  func.func @transform_0(%arg0: i32) -> (i32, i32, i32) {
    %c0_i32 = arith.constant 0 : i32
    %c0_i32_0 = arith.constant 0 : i32
    %c0_i32_1 = arith.constant 0 : i32
    return %arg0, %c0_i32, %c0_i32_0 : i32, i32, i32
  }
  func.func @transform_1(%arg0: i32) -> (i32, i32) {
    %c0_i32 = arith.constant 0 : i32
    %c0_i32_0 = arith.constant 0 : i32
    %c0_i32_1 = arith.constant 0 : i32
    return %c0_i32, %c0_i32_0 : i32, i32
  }
  func.func @transform_2(%arg0: i32) -> (i32, i32) {
    %c0_i32 = arith.constant 0 : i32
    %c0_i32_0 = arith.constant 0 : i32
    %c0_i32_1 = arith.constant 0 : i32
    return %c0_i32, %c0_i32_0 : i32, i32
  }
  func.func @transform_3(%arg0: i32) -> (i32, i32) {
    %c0_i32 = arith.constant 0 : i32
    %c0_i32_0 = arith.constant 0 : i32
    %c0_i32_1 = arith.constant 0 : i32
    return %c0_i32, %c0_i32_0 : i32, i32
  }
  func.func @transform_4(%arg0: i32) -> (i32, i32) {
    %c0_i32 = arith.constant 0 : i32
    %c0_i32_0 = arith.constant 0 : i32
    %c0_i32_1 = arith.constant 0 : i32
    return %c0_i32, %c0_i32_0 : i32, i32
  }
  func.func @transform_5(%arg0: i32) -> (i32, i32) {
    %c0_i32 = arith.constant 0 : i32
    %c0_i32_0 = arith.constant 0 : i32
    %c0_i32_1 = arith.constant 0 : i32
    return %c0_i32, %c0_i32_0 : i32, i32
  }
  func.func @transform_6(%arg0: i32) -> (i32, i32) {
    %c0_i32 = arith.constant 0 : i32
    %c0_i32_0 = arith.constant 0 : i32
    %c0_i32_1 = arith.constant 0 : i32
    return %c0_i32, %c0_i32_0 : i32, i32
  }
  func.func @transform_7(%arg0: i32) -> (i32, i32) {
    %c0_i32 = arith.constant 0 : i32
    %c0_i32_0 = arith.constant 0 : i32
    %c0_i32_1 = arith.constant 0 : i32
    return %c0_i32, %c0_i32_0 : i32, i32
  }
  func.func @transform_8(%arg0: i32) -> (i32, i32) {
    %c0_i32 = arith.constant 0 : i32
    %c0_i32_0 = arith.constant 0 : i32
    %c0_i32_1 = arith.constant 0 : i32
    return %c0_i32, %c0_i32_0 : i32, i32
  }
  func.func @transform_9(%arg0: i32) -> (i32, i32, i32) {
    %c0_i32 = arith.constant 0 : i32
    %c0_i32_0 = arith.constant 0 : i32
    %c0_i32_1 = arith.constant 0 : i32
    return %arg0, %c0_i32, %c0_i32_0 : i32, i32, i32
  }
  func.func @transform_10(%arg0: i32) -> (i32, i32, i32) {
    %c0_i32 = arith.constant 0 : i32
    %c0_i32_0 = arith.constant 0 : i32
    %c0_i32_1 = arith.constant 0 : i32
    return %arg0, %c0_i32, %c0_i32_0 : i32, i32, i32
  }
  func.func @transform_11(%arg0: i32) -> (i32, i32, i32) {
    %c0_i32 = arith.constant 0 : i32
    %c0_i32_0 = arith.constant 0 : i32
    %c0_i32_1 = arith.constant 0 : i32
    return %arg0, %c0_i32, %c0_i32_0 : i32, i32, i32
  }
  func.func @transform_12(%arg0: i32) -> (i32, i32, i32) {
    %c0_i32 = arith.constant 0 : i32
    %c0_i32_0 = arith.constant 0 : i32
    %c0_i32_1 = arith.constant 0 : i32
    return %arg0, %c0_i32, %c0_i32_0 : i32, i32, i32
  }
}

</mosaic_0001>

<bundles_post_ra>
// kernel: tpu_custom_call.1
= control target key start
LH: loop header
LB: loop body
LE: loop exit
PB: predicated region body
PF: predicated region fallthrough
CT: control target
= control target key end

     0   :  { %s5534_s0 = inlined_call_operand.vmem [shape: f32[2,4,256], index: 0, kind: input, shape index: {}]   ;;  %s5535_s1 = inlined_call_operand.vmem [shape: f32[8,4], index: 1, kind: input, shape index: {}]   ;;  %s5536_s2 = inlined_call_operand.vmem [shape: f32[8,36], index: 2, kind: input, shape index: {}]   ;;  %s5537_s3 = inlined_call_operand.vmem [shape: f32[8,36], index: 3, kind: input, shape index: {}]   ;;  %s5538_s4 = inlined_call_operand.vmem [shape: f32[8,36], index: 4, kind: input, shape index: {}]   ;;  %s5539_s5 = inlined_call_operand.vmem [shape: f32[8,1], index: 5, kind: input, shape index: {}]   ;;  %s5540_s6 = inlined_call_operand.vmem [shape: f32[8,1], index: 6, kind: input, shape index: {}]   ;;  %s5541_s7 = inlined_call_operand.vmem [shape: f32[8,1], index: 7, kind: input, shape index: {}]   ;;  %s5542_s8 = inlined_call_operand.vmem [shape: f32[8,1], index: 8, kind: input, shape index: {}]   ;;  %s5543_s9 = inlined_call_operand.hbm [shape: f32[2,8,256], index: 9, kind: output, shape index: {0}]   ;;  %s5544_s10 = inlined_call_operand.hbm [shape: f32[2,8,256], index: 10, kind: output, shape index: {1}]   ;;  %s5545_s11 = inlined_call_operand.hbm [shape: f32[2,8,256], index: 11, kind: output, shape index: {2}]   ;;  %s5546_s12 = inlined_call_operand.hbm [shape: f32[2,8,256], index: 12, kind: output, shape index: {3}]  }
   0x1   :  { %5591 = sst [smem:[#allocation43_spill]] %s5534_s0 }
   0x2   :  { %5592 = sst [smem:[#allocation44_spill]] %s5535_s1 }
   0x3   :  { %5593 = sst [smem:[#allocation45_spill]] %s5536_s2 }
   0x4   :  { %5594 = sst [smem:[#allocation46_spill]] %s5537_s3 }
   0x5   :  { %5595 = sst [smem:[#allocation47_spill]] %s5538_s4 }
   0x6   :  { %5596 = sst [smem:[#allocation48_spill]] %s5539_s5 }
   0x7   :  { %5597 = sst [smem:[#allocation49_spill]] %s5540_s6 }
   0x8   :  { %18 = vsyncpa [#allocation5], 0 }
   0x9   :  { %20 = vsyncpa [#allocation5 + $0x1], 0 }
   0xa   :  { %21 = vsyncpa [#allocation7], 0 }
   0xb   :  { %23 = vsyncpa [#allocation7 + $0x1], 0 }
   0xc   :  { %24 = vsyncpa [#allocation10], 0 }
   0xd   :  { %26 = vsyncpa [#allocation10 + $0x1], 0  ;;  %s3800_s21 = smov 0   ;;  %s3802_s22 = smov 0  }
   0xe   :  { %s3804_s23 = smov 0   ;;  %s3806_s24 = smov 0  }
   0xf LB: > { %s3821_s25 = sadd.s32 4294967295, %s3715_s24   ;;  %s5547_s26 = sadd.s32 4294967294, %s3715_s24   ;;  %s3715_s24 = sphi %s3806_s24, %s5684_s24   ;;  %s3711_s23 = sphi %s3804_s23, %s5683_s23   ;;  %s3707_s22 = sphi %s3802_s22, %s5682_s22   ;;  %s3703_s21 = sphi %s3800_s21, %s5681_s21  }
  0x10   : > { %s3825_s27 = sadd.s32 1, %s3715_s24   ;;  %s233_s28 = sadd.s32 1, %s3711_s23 }
  0x11   : > { %s230_s29 = ssub.s32 %s3715_s24, %s3825_s27  ;;  %p243_p0 = scmp.ne.s32.totalorder %s3711_s23, %s3707_s22 }
  0x12   : > { %p231_p1 = scmp.eq.s32.totalorder %s230_s29, 0  ;;  %p244_p2 = scmp.eq.s32.totalorder %s3821_s25, 1 }
  0x13   : > { %p249_p3 = scmp.ne.s32.totalorder %s3707_s22, %s3703_s21  ;;  %p250_p4 = scmp.eq.s32.totalorder %s5547_s26, 1 }
  0x14   : > { %s3838_s30 = scalar_select %p231_p1, %s3711_s23, %s233_s28  }
  0x15   : > { %p3840_p5 = por %p244_p2, %p243_p0  ;;  %p3844_p6 = por %p250_p4, %p249_p3 }
  0x16   : > { %p3436_p7 = scmp.ge.s32.totalorder %s3715_s24, 1  ;;  %p378_p8 = scmp.lt.s32.totalorder %s3715_s24, 3 }
  0x18   : > { %p379_p9 = pnand %p3436_p7, %p378_p8 }
  0x1a   : > { %382 = sbr.rel (%p379_p9) target bundleno = 1023 (0x3ff), region = 56 }
  0x1f   : > { %p435_p10 = scmp.lt.s32.totalorder %s3821_s25, 1  ;;  %v5556_v0 = vmov 0.0   ;;  %v3718_v1 = vmov 0   ;;  %s5600_s0 = sld [smem:[#allocation43_spill]]  ;;  %vm454_vm0 = vcmask 1043456   ;;  %vm450_vm1 = vcmask 31744  }
  0x20   : > { %523 = vmatprep.mubr.f32.mxu0 %v5556_v0  ;;  %3034 = vmatprep.mubr.f32.mxu1 %v5556_v0  ;;  %s5550_s20 = smov 80   ;;  %s5548_s28 = smov 112   ;;  %vm532_vm2 = vcmask 146432   ;;  %v3726_v7 = vmov 1983009808   ;;  %v587_v9 = vlaneseq  ;;  %vm535_vm3 = vcmask 140288  }
  0x21   : > { %s436_s15 = scalar_select %p435_p10, %s3821_s25, 1  ;;  %3546 = vset.pattern.permute.xlu1 %v3718_v1  ;;  %3547 = vset.pattern.permute.xlu0 %v3718_v1  ;;  %537 = vst.msk [vmem:[#allocation2 + $0x18] sm:$0xff] %vm532_vm2, %v5556_v0  ;;  %538 = vst.msk [vmem:[#allocation2 + $0x20] sm:$0xff] %vm532_vm2, %v5556_v0  ;;  %v585_v8 = vunpack.c.l.s4 %v3726_v7  ;;  %v3727_v16 = vmov 1934713408   ;;  %vm767_vm4 = vcmask 138248  }
  0x22   : > { %s5601_s1 = sld [smem:[#allocation44_spill]]  ;;  %s5554_s17 = smov 96   ;;  %533 = vst.msk [vmem:[#allocation2] sm:$0xff] %vm532_vm2, %v5556_v0  ;;  %534 = vst.msk [vmem:[#allocation2 + $0x8] sm:$0xff] %vm532_vm2, %v5556_v0  ;;  %v588_v12 = vshrl.u32 %v587_v9, 7  ;;  %v602_v17 = vunpack.c.l.s4 %v3727_v16  ;;  %vm976_vm5 = vcmask 130048  }
  0x23   : > { %s3473_s16 = sshll.u32 %s436_s15, 3  ;;  %s5568_s18 = smov 32   ;;  %540 = vst.msk [vmem:[#allocation2 + $0x30] sm:$0xff] %vm532_vm2, %v5556_v0  ;;  %541 = vst.msk [vmem:[#allocation2 + $0x38] sm:$0xff] %vm532_vm2, %v5556_v0  ;;  %v586_v11 = vunpack.c.0.s8 %v585_v8  ;;  %vm978_vm6 = vcmask 261120   ;;  %vm980_vm7 = vcmask 392192  }
  0x24   : > { %s5602_s5 = sld [smem:[#allocation48_spill]]  ;;  %s5559_s26 = smov 16   ;;  %543 = vst.msk [vmem:[#allocation2 + $0x48] sm:$0xff] %vm532_vm2, %v5556_v0  ;;  %544 = vst.msk [vmem:[#allocation2 + $0x50] sm:$0xff] %vm532_vm2, %v5556_v0  ;;  %v603_v25 = vunpack.c.0.s8 %v602_v17  ;;  %vm982_vm8 = vcmask 523264   ;;  %vm984_vm9 = vcmask 654336  }
  0x25   : > { %s439_s19 = scalar_lea.vmem %s5600_s0, %s3473_s16  ;;  %s5579_s16 = smov 64   ;;  %v3894_v18 = vsub.s32 %v586_v11, %v588_v12  ;;  %539 = vst.msk [vmem:[#allocation2 + $0x28] sm:$0x3] %vm535_vm3, %v5556_v0  ;;  %536 = vst.msk [vmem:[#allocation2 + $0x10] sm:$0x3] %vm535_vm3, %v5556_v0  ;;  %vm986_vm10 = vcmask 785408  }
  0x26   : > { %v3857_v2 = vld [vmem:[%s439_s19] sm:$0xff]  ;;  %s5552_s19 = smov 48   ;;  %v3899_v38 = vsub.s32 %v603_v25, %v588_v12  ;;  %542 = vst.msk [vmem:[#allocation2 + $0x40] sm:$0x3] %vm535_vm3, %v5556_v0  ;;  %545 = vst.msk [vmem:[#allocation2 + $0x58] sm:$0x3] %vm535_vm3, %v5556_v0 }
  0x27   : > { %556 = vrot.lane.b32.xlu1 %v3857_v2, %s5550_s20  ;;  %548 = vrot.lane.b32.xlu0 %v3857_v2, %s5548_s28  ;;  %v449_v3 = vcombine.high %v3857_v2, %v3857_v2  ;;  %v546_v22 = vrot.slane %v3857_v2, 4  ;;  %s3728_s29 = smov 1   ;;  %s3920_s15 = sand.u32 1, %s3707_s22   ;;  %vm988_vm11 = vcmask 916480   ;;  %vm2960_vm12 = vcmask 293888  }
  0x28   : > { %v441_v4 = vld [vmem:[%s5601_s1] sm:$0xff]  ;;  %s3923_s28 = sshll.u32 %s3920_s15, 4  ;;  %s5634_s0 = smov 64  }
  0x29   : > { %3443 = vmatprep.subr.msk.mxu0 %vm454_vm0, %v449_v3  ;;  %s3926_s20 = scalar_lea.vmem [#allocation4], %s3923_s28  ;;  %s5669_s6 = sld [smem:[#allocation49_spill]] }
  0x2a   : > { %3444 = vmatpush1.msk.msra.mxu0 %vm454_vm0, %v3857_v2  ;;  %v442_v5 = vld [vmem:[%s5602_s5] sm:$0xff]  ;;  %s5676_s2 = sld [smem:[#allocation45_spill]]  ;;  %s3210_s1 = scalar_lea.sflag [#allocation5], %s3920_s15 }
  0x2b   : > { %560 = vrot.lane.b32.xlu1 %v3857_v2, %s5579_s16  ;;  %552 = vrot.lane.b32.xlu0 %v3857_v2, %s5554_s17  ;;  %s5677_s3 = sld [smem:[#allocation46_spill]] }
  0x2c   : > { %3445 = vmatmul.mubr.msk.f32.vlgmr.msra.gmra.mxu0 %vm450_vm1, %v441_v4  ;;  %s5679_s4 = sld [smem:[#allocation47_spill]] }
  0x2d   : > { %3117 = vmatprep.mubr.f32.mxu0 %v5556_v0 }
  0x2f   : > { %568 = vrot.lane.b32.xlu1 %v3857_v2, %s5568_s18  ;;  %564 = vrot.lane.b32.xlu0 %v3857_v2, %s5552_s19  ;;  %s3730_s19 = smov 127  }
  0x33   : > { %572 = vrot.lane.b32.xlu0 %v3857_v2, %s5559_s26  ;;  %445 = vperm.xlu1 %3546, %v442_v5  }
  0x99   : > { %v557_v6 = vpop.permute.xlu1 %556  ;;  %v549_v10 = vpop.permute.xlu0 %548 }
  0x9a   : > { %v591_v19 = vcombine.low %v549_v10, %v557_v6  ;;  %v558_v29 = vrot.slane %v557_v6, 4  ;;  %v550_v30 = vrot.slane %v549_v10, 4 }
  0x9c   : > { %v598_v31 = vrot.slane %v591_v19, %v3894_v18  ;;  %v659_v43 = vcombine.low %v550_v30, %v558_v29 }
  0x9d   : > { %v561_v13 = vpop.permute.xlu1 %560  ;;  %v553_v14 = vpop.permute.xlu0 %552 }
  0x9e   : > { %v583_v15 = vcombine.low %v3857_v2, %v553_v14  ;;  %v554_v23 = vrot.slane %v553_v14, 4  ;;  %v562_v26 = vrot.slane %v561_v13, 4  ;;  %v666_v52 = vrot.slane %v659_v43, %v3894_v18 }
  0xa0   : > { %v590_v24 = vrot.slane %v583_v15, %v3894_v18  ;;  %v651_v37 = vcombine.low %v546_v22, %v554_v23 }
  0xa1   : > { %v569_v20 = vpop.permute.xlu1 %568  ;;  %v565_v21 = vpop.permute.xlu0 %564 }
  0xa2   : > { %v570_v27 = vrot.slane %v569_v20, 4  ;;  %v617_v28 = vcombine.low %v561_v13, %v569_v20  ;;  %v566_v33 = vrot.slane %v565_v21, 4  ;;  %v599_v36 = vcombine.low %v590_v24, %v598_v31 }
  0xa3   : > { %v600_v47 = vcombine.high %v590_v24, %v598_v31  ;;  %v658_v48 = vrot.slane %v651_v37, %v3894_v18 }
  0xa4   : > { %v624_v39 = vrot.slane %v617_v28, %v3894_v18  ;;  %v685_v40 = vcombine.low %v562_v26, %v570_v27  ;;  %v607_v50 = vrot.slane %v599_v36, %v3899_v38 }
  0xa5   : > { %v573_v32 = vpop.permute.xlu0 %572  ;;  %v614_v57 = vrot.slane %v600_v47, %v3899_v38  ;;  %v667_v58 = vcombine.low %v658_v48, %v666_v52  ;;  %v668_v1 = vcombine.high %v658_v48, %v666_v52 }
  0xa6   : > { %v574_v34 = vrot.slane %v573_v32, 4  ;;  %v625_v35 = vcombine.low %v565_v21, %v573_v32  ;;  %v692_v49 = vrot.slane %v685_v40, %v3894_v18 }
  0xa7   : > { %v675_v63 = vrot.slane %v667_v58, %v3899_v38  ;;  %v682_v5 = vrot.slane %v668_v1, %v3899_v38 }
  0xa8   : > { %v632_v41 = vrot.slane %v625_v35, %v3894_v18  ;;  %v693_v42 = vcombine.low %v566_v33, %v574_v34 }
  0xaa   : > { %v633_v44 = vcombine.low %v624_v39, %v632_v41  ;;  %v634_v45 = vcombine.high %v624_v39, %v632_v41  ;;  %v700_v46 = vrot.slane %v693_v42, %v3894_v18 }
  0xac   : > { %v641_v51 = vrot.slane %v633_v44, %v3899_v38  ;;  %v648_v55 = vrot.slane %v634_v45, %v3899_v38  ;;  %v701_v56 = vcombine.low %v692_v49, %v700_v46  ;;  %v702_v62 = vcombine.high %v692_v49, %v700_v46 }
  0xae   : > { %v3446_v53 = vcombine.high %v607_v50, %v641_v51  ;;  %v735_v54 = vcombine.low %v607_v50, %v641_v51  ;;  %v3448_v59 = vcombine.high %v614_v57, %v648_v55  ;;  %v739_v60 = vcombine.low %v614_v57, %v648_v55  ;;  %v446_v8 = vpop.permute.xlu1 %445 }
  0xaf   : > { %v709_v61 = vrot.slane %v701_v56, %v3899_v38  ;;  %v716_v4 = vrot.slane %v702_v62, %v3899_v38 }
  0xb0   : > { %747 = vrot.lane.b32.xlu0 %v3446_v53, %s3728_s29  ;;  %743 = vrot.lane.b32.xlu1 %v735_v54, %s3728_s29 }
  0xb1   : > { %v3447_v2 = vcombine.high %v675_v63, %v709_v61  ;;  %v736_v3 = vcombine.low %v675_v63, %v709_v61  ;;  %v3449_v6 = vcombine.high %v682_v5, %v716_v4  ;;  %v740_v7 = vcombine.low %v682_v5, %v716_v4 }
  0xb4   : > { %755 = vrot.lane.b32.xlu0 %v3448_v59, %s3728_s29  ;;  %751 = vrot.lane.b32.xlu1 %v739_v60, %s3728_s29 }
  0xb8   : > { %749 = vrot.lane.b32.xlu0 %v3447_v2, %s3728_s29  ;;  %745 = vrot.lane.b32.xlu1 %v736_v3, %s3728_s29 }
  0xbc   : > { %757 = vrot.lane.b32.xlu0 %v3449_v6, %s3728_s29  ;;  %753 = vrot.lane.b32.xlu1 %v740_v7, %s3728_s29  ;;  %s3729_s29 = smov 126  }
  0xec   : > { %v525_v9 = vpop.f32.mrf.mxu0 }
  0xed   : > { %v526_v10 = vadd.f32 %v525_v9, %v446_v8 }
  0xee   : > { %v527_v11 = vpop.f32.mrf.mxu0 }
  0xef   : > { %v528_v12 = vadd.f32 %v527_v11, %v446_v8  ;;  %530 = vst [vmem:[%s3926_s20] sm:$0xff] %v526_v10 }
  0xf1   : > { %531 = vst [vmem:[%s3926_s20 + $0x8] sm:$0xff] %v528_v12 }
 0x122   : > { %v748_v13 = vpop.permute.xlu0 %747  ;;  %v744_v14 = vpop.permute.xlu1 %743 }
 0x123   : > { %770 = vst.msk [vmem:[#allocation2 + $0x19] sm:$0xff] %vm767_vm4, %v748_v13  ;;  %768 = vst.msk [vmem:[#allocation2 + $0x1] sm:$0xff] %vm767_vm4, %v744_v14 }
 0x126   : > { %v756_v15 = vpop.permute.xlu0 %755  ;;  %v752_v16 = vpop.permute.xlu1 %751 }
 0x127   : > { %774 = vst.msk [vmem:[#allocation2 + $0x49] sm:$0xff] %vm767_vm4, %v756_v15  ;;  %772 = vst.msk [vmem:[#allocation2 + $0x31] sm:$0xff] %vm767_vm4, %v752_v16 }
 0x12a   : > { %v750_v17 = vpop.permute.xlu0 %749  ;;  %v746_v19 = vpop.permute.xlu1 %745  ;;  %v1971_v20 = vld [vmem:[#allocation2 + $0x1] sm:$0xff]  ;;  %v1973_v21 = vld [vmem:[#allocation2 + $0x19] sm:$0xff] }
 0x12b   : > { %771 = vst.msk [vmem:[#allocation2 + $0x21] sm:$0xff] %vm767_vm4, %v750_v17  ;;  %769 = vst.msk [vmem:[#allocation2 + $0x9] sm:$0xff] %vm767_vm4, %v746_v19  ;;  %1987 = vrot.lane.b32.xlu0 %v1971_v20, %s3729_s29  ;;  %1991 = vrot.lane.b32.xlu1 %v1973_v21, %s3729_s29  ;;  %v999_v27 = vld [vmem:[#allocation2] sm:$0xff]  ;;  %v1001_v28 = vld [vmem:[#allocation2 + $0x18] sm:$0xff] }
 0x12e   : > { %v758_v22 = vpop.permute.xlu0 %757  ;;  %v754_v23 = vpop.permute.xlu1 %753  ;;  %v1975_v24 = vld [vmem:[#allocation2 + $0x31] sm:$0xff]  ;;  %v1977_v25 = vld [vmem:[#allocation2 + $0x49] sm:$0xff] }
 0x12f   : > { %v1003_v26 = vld [vmem:[#allocation2 + $0x30] sm:$0xff]  ;;  %775 = vst.msk [vmem:[#allocation2 + $0x51] sm:$0xff] %vm767_vm4, %v758_v22  ;;  %773 = vst.msk [vmem:[#allocation2 + $0x39] sm:$0xff] %vm767_vm4, %v754_v23  ;;  %1995 = vrot.lane.b32.xlu0 %v1975_v24, %s3729_s29  ;;  %1999 = vrot.lane.b32.xlu1 %v1977_v25, %s3729_s29  ;;  %v1005_v29 = vld [vmem:[#allocation2 + $0x48] sm:$0xff]  ;;  %v1510_v30 = vcombine.high %v1971_v20, %v1975_v24  ;;  %v1526_v31 = vcombine.high %v1973_v21, %v1977_v25 }
 0x130   : > { %v1509_v32 = vcombine.low %v1971_v20, %v1975_v24  ;;  %v1525_v33 = vcombine.low %v1973_v21, %v1977_v25  ;;  %v784_v34 = vcombine.low %v999_v27, %v1003_v26  ;;  %v800_v35 = vcombine.low %v1001_v28, %v1005_v29 }
 0x131   : > { %v785_v36 = vcombine.high %v999_v27, %v1003_v26  ;;  %v3943_v37 = vrot.slane %v1510_v30, %v3894_v18  ;;  %v3946_v39 = vrot.slane %v1526_v31, %v3894_v18  ;;  %v801_v41 = vcombine.high %v1001_v28, %v1005_v29 }
 0x132   : > { %v3949_v40 = vrot.slane %v1509_v32, %v3894_v18  ;;  %v3952_v42 = vrot.slane %v1525_v33, %v3894_v18  ;;  %v3955_v43 = vrot.slane %v784_v34, %v3894_v18  ;;  %v3958_v44 = vrot.slane %v800_v35, %v3894_v18  ;;  %v2442_v57 = vld [vmem:[#allocation2 + $0xa] sm:$0xff]  ;;  %v2444_v58 = vld [vmem:[#allocation2 + $0x22] sm:$0xff]  ;;  %v2443_v8 = vld [vmem:[#allocation2 + $0x1a] sm:$0xff] }
 0x133   : > { %v3961_v45 = vrot.slane %v785_v36, %v3894_v18  ;;  %1739 = vrot.lane.b32.xlu0 %v1971_v20, %s3730_s19  ;;  %1743 = vrot.lane.b32.xlu1 %v1973_v21, %s3730_s19  ;;  %v1557_v46 = vcombine.low %v3943_v37, %v3946_v39  ;;  %v1558_v47 = vcombine.high %v3943_v37, %v3946_v39  ;;  %v2441_v9 = vld [vmem:[#allocation2 + $0x2] sm:$0xff] }
 0x134   : > { %v3970_v48 = vrot.slane %v801_v41, %v3894_v18  ;;  %v1542_v49 = vcombine.high %v3949_v40, %v3952_v42  ;;  %v817_v50 = vcombine.high %v3955_v43, %v3958_v44  ;;  %v1541_v51 = vcombine.low %v3949_v40, %v3952_v42  ;;  %v4030_v12 = vld [vmem:[#allocation2 + $0x21] sm:$0xff]  ;;  %v4032_v13 = vld [vmem:[#allocation2 + $0x9] sm:$0xff] }
 0x135   : > { %5603 = vst [vmem:[#allocation14_spill] sm:$0xff] %v3961_v45  ;;  %v816_v52 = vcombine.low %v3955_v43, %v3958_v44  ;;  %v4050_v16 = vld [vmem:[#allocation2 + $0x20] sm:$0xff]  ;;  %v4052_v17 = vld [vmem:[#allocation2 + $0x8] sm:$0xff]  ;;  %v4121_v42 = vrot.slane %v1558_v47, %v3899_v38 }
 0x136   : > { %5604 = vst [vmem:[#allocation15_spill] sm:$0xff] %v3970_v48  ;;  %v832_v53 = vcombine.low %v3961_v45, %v3970_v48  ;;  %v2448_v55 = vld [vmem:[#allocation2 + $0x52] sm:$0xff]  ;;  %v2446_v56 = vld [vmem:[#allocation2 + $0x3a] sm:$0xff]  ;;  %v2447_v10 = vld [vmem:[#allocation2 + $0x4a] sm:$0xff]  ;;  %v4091_v30 = vrot.slane %v817_v50, %v3899_v38  ;;  %v4100_v32 = vrot.slane %v1541_v51, %v3899_v38 }
 0x137   : > { %1747 = vrot.lane.b32.xlu0 %v1975_v24, %s3730_s19  ;;  %1751 = vrot.lane.b32.xlu1 %v1977_v25, %s3730_s19  ;;  %v2301_v59 = vcombine.low %v2442_v57, %v2446_v56  ;;  %v2317_v60 = vcombine.low %v2444_v58, %v2448_v55  ;;  %v2302_v1 = vcombine.high %v2442_v57, %v2446_v56  ;;  %v2445_v11 = vld [vmem:[#allocation2 + $0x32] sm:$0xff] }
 0x138   : > { %v2318_v2 = vcombine.high %v2444_v58, %v2448_v55  ;;  %v4038_v14 = vld [vmem:[#allocation2 + $0x51] sm:$0xff]  ;;  %v1976_v15 = vld [vmem:[#allocation2 + $0x39] sm:$0xff]  ;;  %v2233_v21 = vcombine.low %v2441_v9, %v2445_v11  ;;  %v2249_v22 = vcombine.low %v2443_v8, %v2447_v10  ;;  %v4076_v25 = vrot.slane %v1557_v46, %v3899_v38 }
 0x139   : > { %v3987_v61 = vrot.slane %v2301_v59, %v3894_v18  ;;  %v3992_v62 = vrot.slane %v2317_v60, %v3894_v18  ;;  %v3999_v3 = vrot.slane %v2302_v1, %v3894_v18  ;;  %v1006_v19 = vld [vmem:[#allocation2 + $0x50] sm:$0xff]  ;;  %v1004_v20 = vld [vmem:[#allocation2 + $0x38] sm:$0xff]  ;;  %v1577_v35 = vcombine.low %v4032_v13, %v1976_v15 }
 0x13a   : > { %v4002_v4 = vrot.slane %v2318_v2, %v3894_v18  ;;  %v4065_v23 = vrot.slane %v2233_v21, %v3894_v18  ;;  %v4068_v24 = vrot.slane %v2249_v22, %v3894_v18  ;;  %v1593_v36 = vcombine.low %v4030_v12, %v4038_v14 }
 0x13b   : > { %1015 = vrot.lane.b32.xlu0 %v999_v27, %s3730_s19  ;;  %1019 = vrot.lane.b32.xlu1 %v1001_v28, %s3730_s19  ;;  %v2334_v63 = vcombine.high %v3987_v61, %v3992_v62  ;;  %v2333_v7 = vcombine.low %v3987_v61, %v3992_v62  ;;  %v852_v40 = vcombine.low %v4052_v17, %v1004_v20 }
 0x13c   : > { %v2349_v5 = vcombine.low %v3999_v3, %v4002_v4  ;;  %v2350_v6 = vcombine.high %v3999_v3, %v4002_v4  ;;  %v868_v41 = vcombine.low %v4050_v16, %v1006_v19  ;;  %v1573_v46 = vcombine.high %v4100_v32, %v5556_v0 }
 0x13d   : > { %v1585_v50 = vrot.slane %v1577_v35, %v3894_v18  ;;  %v1601_v51 = vrot.slane %v1593_v36, %v3894_v18  ;;  %v4142_v39 = vrot.slane %v832_v53, %v3899_v38  ;;  %v4158_v53 = vrot.slane %v2334_v63, %v3899_v38 }
 0x13e   : > { %v4136_v37 = vrot.slane %v868_v41, %v3894_v18  ;;  %v2265_v35 = vcombine.low %v4065_v23, %v4068_v24  ;;  %v4246_v4 = vrot.slane %v816_v52, %v3899_v38  ;;  %v1575_v52 = vcombine.high %v4076_v25, %v5556_v0 }
 0x13f   : > { %1023 = vrot.lane.b32.xlu0 %v1003_v26, %s3730_s19  ;;  %1027 = vrot.lane.b32.xlu1 %v1005_v29, %s3730_s19  ;;  %v1610_v59 = vcombine.high %v1585_v50, %v1601_v51 }
 0x140   : > { %5607 = vst [vmem:[#allocation17_spill] sm:$0xff] %v4246_v4 }
 0x141   : > { %v4171_v63 = vrot.slane %v1610_v59, %v3899_v38 }
 0x143   : > { %1269 = vrot.lane.b32.xlu0 %v999_v27, %s3729_s29  ;;  %1273 = vrot.lane.b32.xlu1 %v1001_v28, %s3729_s29  ;;  %v2266_v27 = vcombine.high %v4065_v23, %v4068_v24  ;;  %v2234_v28 = vcombine.high %v2441_v9, %v2445_v11  ;;  %v4230_v23 = vrot.slane %v2265_v35, %v3899_v38 }
 0x144   : > { %v1609_v24 = vcombine.low %v1585_v50, %v1601_v51  ;;  %v2366_v35 = vcombine.high %v4158_v53, %v5556_v0 }
 0x145   : > { %v4094_v31 = vrot.slane %v2266_v27, %v3899_v38  ;;  %v4103_v33 = vrot.slane %v2234_v28, %v3894_v18  ;;  %v2297_v3 = vcombine.high %v4230_v23, %v5556_v0 }
 0x147   : > { %1277 = vrot.lane.b32.xlu0 %v1003_v26, %s3729_s29  ;;  %1281 = vrot.lane.b32.xlu1 %v1005_v29, %s3729_s29  ;;  %v1556_v26 = vrot.slane %v1542_v49, %v3899_v38  ;;  %v2250_v29 = vcombine.high %v2443_v8, %v2447_v10  ;;  %v2298_v59 = vcombine.high %v4094_v31, %v5556_v0 }
 0x149   : > { %v4106_v34 = vrot.slane %v2250_v29, %v3894_v18 }
 0x14b   : > { %2463 = vrot.lane.b32.xlu1 %v2444_v58, %s3730_s19  ;;  %2459 = vrot.lane.b32.xlu0 %v2442_v57, %s3730_s19  ;;  %v2281_v49 = vcombine.low %v4103_v33, %v4106_v34  ;;  %v2282_v36 = vcombine.high %v4103_v33, %v4106_v34 }
 0x14d   : > { %v4145_v47 = vrot.slane %v2281_v49, %v3899_v38 }
 0x14f   : > { %2471 = vrot.lane.b32.xlu1 %v2448_v55, %s3730_s19  ;;  %2467 = vrot.lane.b32.xlu0 %v2446_v56, %s3730_s19 }
 0x153   : > { %2717 = vrot.lane.b32.xlu1 %v2444_v58, %s3729_s29  ;;  %2713 = vrot.lane.b32.xlu0 %v2442_v57, %s3729_s29  ;;  %v1594_v57 = vcombine.high %v4030_v12, %v4038_v14  ;;  %v1574_v58 = vcombine.high %v1556_v26, %v5556_v0 }
 0x155   : > { %v1608_v2 = vrot.slane %v1594_v57, %v3894_v18  ;;  %v848_v57 = vcombine.high %v4246_v4, %v5556_v0 }
 0x157   : > { %2725 = vrot.lane.b32.xlu1 %v2448_v55, %s3729_s29  ;;  %2721 = vrot.lane.b32.xlu0 %v2446_v56, %s3729_s29  ;;  %v4133_v55 = vrot.slane %v852_v40, %v3894_v18  ;;  %v1578_v56 = vcombine.high %v4032_v13, %v1976_v15 }
 0x159   : > { %v885_v60 = vcombine.high %v4133_v55, %v4136_v37  ;;  %v1592_v1 = vrot.slane %v1578_v56, %v3894_v18  ;;  %v2296_v56 = vrot.slane %v2282_v36, %v3899_v38 }
 0x15b   : > { %2461 = vrot.lane.b32.xlu1 %v2443_v8, %s3730_s19  ;;  %2457 = vrot.lane.b32.xlu0 %v2441_v9, %s3730_s19  ;;  %v1625_v21 = vcombine.low %v1592_v1, %v1608_v2  ;;  %v2300_v36 = vcombine.high %v2296_v56, %v5556_v0 }
 0x15d   : > { %v1633_v28 = vrot.slane %v1625_v21, %v3899_v38 }
 0x15f   : > { %2469 = vrot.lane.b32.xlu1 %v2447_v10, %s3730_s19  ;;  %2465 = vrot.lane.b32.xlu0 %v2445_v11, %s3730_s19 }
 0x163   : > { %2715 = vrot.lane.b32.xlu1 %v2443_v8, %s3729_s29  ;;  %2711 = vrot.lane.b32.xlu0 %v2441_v9, %s3729_s29  ;;  %v853_v8 = vcombine.high %v4052_v17, %v1004_v20  ;;  %v869_v9 = vcombine.high %v4050_v16, %v1006_v19 }
 0x167   : > { %2723 = vrot.lane.b32.xlu1 %v2447_v10, %s3729_s29  ;;  %2719 = vrot.lane.b32.xlu0 %v2445_v11, %s3729_s29 }
 0x16b   : > { %1993 = vrot.lane.b32.xlu1 %v4030_v12, %s3729_s29  ;;  %1989 = vrot.lane.b32.xlu0 %v4032_v13, %s3729_s29 }
 0x16f   : > { %2001 = vrot.lane.b32.xlu1 %v4038_v14, %s3729_s29  ;;  %1997 = vrot.lane.b32.xlu0 %v1976_v15, %s3729_s29 }
 0x173   : > { %1745 = vrot.lane.b32.xlu1 %v4030_v12, %s3730_s19  ;;  %1741 = vrot.lane.b32.xlu0 %v4032_v13, %s3730_s19  ;;  %v4178_v12 = vrot.slane %v885_v60, %v3899_v38  ;;  %v1626_v13 = vcombine.high %v1592_v1, %v1608_v2  ;;  %v884_v60 = vcombine.low %v4133_v55, %v4136_v37 }
 0x174   : > { %v1576_v37 = vcombine.high %v4121_v42, %v5556_v0 }
 0x177   : > { %1753 = vrot.lane.b32.xlu1 %v4038_v14, %s3730_s19  ;;  %1749 = vrot.lane.b32.xlu0 %v1976_v15, %s3730_s19  ;;  %v867_v14 = vrot.slane %v853_v8, %v3894_v18  ;;  %v883_v15 = vrot.slane %v869_v9, %v3894_v18  ;;  %v849_v8 = vcombine.high %v4091_v30, %v5556_v0 }
 0x178   : > { %v4284_v9 = vrot.slane %v884_v60, %v3899_v38 }
 0x179   : > { %v900_v22 = vcombine.low %v867_v14, %v883_v15  ;;  %v901_v29 = vcombine.high %v867_v14, %v883_v15  ;;  %v850_v14 = vcombine.high %v4142_v39, %v5556_v0  ;;  %v1643_v15 = vcombine.high %v1633_v28, %v5556_v0 }
 0x17a   : > { %5610 = vst [vmem:[#allocation19_spill] sm:$0xff] %v4284_v9 }
 0x17b   : > { %1021 = vrot.lane.b32.xlu1 %v4050_v16, %s3730_s19  ;;  %1017 = vrot.lane.b32.xlu0 %v4052_v17, %s3730_s19  ;;  %v4227_v49 = vrot.slane %v901_v29, %v3899_v38 }
 0x17d   : > { %5606 = vst [vmem:[#allocation16_spill] sm:$0xff] %v4227_v49 }
 0x17f   : > { %1029 = vrot.lane.b32.xlu1 %v1006_v19, %s3730_s19  ;;  %1025 = vrot.lane.b32.xlu0 %v1004_v20, %s3730_s19  ;;  %s5605_s19 = smov 48  }
 0x183   : > { %1275 = vrot.lane.b32.xlu1 %v4050_v16, %s3729_s29  ;;  %1271 = vrot.lane.b32.xlu0 %v4052_v17, %s3729_s29 }
 0x187   : > { %1283 = vrot.lane.b32.xlu1 %v1006_v19, %s3729_s29  ;;  %1279 = vrot.lane.b32.xlu0 %v1004_v20, %s3729_s29  ;;  %v4194_v19 = vrot.slane %v2349_v5, %v3899_v38  ;;  %v4197_v20 = vrot.slane %v1626_v13, %v3899_v38  ;;  %v4209_v5 = vrot.slane %v900_v22, %v3899_v38  ;;  %s5609_s29 = smov 80  }
 0x18b   : > { %1658 = vrot.lane.b32.xlu1 %v4076_v25, %s5579_s16  ;;  %1650 = vrot.lane.b32.xlu0 %v1556_v26, %s5568_s18  ;;  %v2299_v25 = vcombine.high %v4145_v47, %v5556_v0 }
 0x18f   : > { %925 = vrot.lane.b32.xlu1 %v4091_v30, %s5568_s18  ;;  %2374 = vrot.lane.b32.xlu0 %v4094_v31, %s5568_s18  ;;  %v916_v30 = vcombine.high %v4284_v9, %v5556_v0 }
 0x193   : > { %1666 = vrot.lane.b32.xlu1 %v4121_v42, %s5554_s17  ;;  %1646 = vrot.lane.b32.xlu0 %v1573_v46, %s5559_s26  ;;  %v2364_v46 = vrot.slane %v2350_v6, %v3899_v38  ;;  %v4249_v6 = vrot.slane %v1609_v24, %v3899_v38  ;;  %v4309_v42 = vrot.slane %v2333_v7, %v3899_v38 }
 0x195   : > { %5608 = vst [vmem:[#allocation18_spill] sm:$0xff] %v4249_v6  ;;  %5612 = vst [vmem:[#allocation20_spill] sm:$0xff] %v4309_v42  ;;  %v2365_v29 = vcombine.high %v4309_v42, %v5556_v0 }
 0x197   : > { %933 = vrot.lane.b32.xlu1 %v4142_v39, %s5579_s16  ;;  %2382 = vrot.lane.b32.xlu0 %v4145_v47, %s5579_s16  ;;  %v2368_v39 = vcombine.high %v2364_v46, %v5556_v0 }
 0x19b   : > { %2402 = vrot.lane.b32.xlu1 %v4158_v53, %s5568_s18  ;;  %1654 = vrot.lane.b32.xlu0 %v1574_v58, %s5605_s19  ;;  %v1641_v58 = vcombine.high %v4249_v6, %v5556_v0  ;;  %v1642_v53 = vcombine.high %v4171_v63, %v5556_v0 }
 0x19d   : > { %v4173_v10 = vpop.permute.xlu0 %1987  ;;  %v4175_v11 = vpop.permute.xlu1 %1991 }
 0x19f   : > { %1678 = vrot.lane.b32.xlu1 %v4171_v63, %s5568_s18  ;;  %953 = vrot.lane.b32.xlu0 %v4178_v12, %s5568_s18 }
 0x1a1   : > { %v4186_v16 = vpop.permute.xlu0 %1995  ;;  %v4188_v17 = vpop.permute.xlu1 %1999 }
 0x1a3   : > { %2410 = vrot.lane.b32.xlu1 %v4194_v19, %s5579_s16  ;;  %1694 = vrot.lane.b32.xlu0 %v4197_v20, %s5554_s17 }
 0x1a5   : > { %v4203_v26 = vpop.permute.xlu0 %1739  ;;  %v4205_v27 = vpop.permute.xlu1 %1743 }
 0x1a7   : > { %1686 = vrot.lane.b32.xlu1 %v1633_v28, %s5579_s16  ;;  %961 = vrot.lane.b32.xlu0 %v4209_v5, %s5579_s16 }
 0x1a9   : > { %v4218_v40 = vpop.permute.xlu0 %1747  ;;  %v4220_v41 = vpop.permute.xlu1 %1751 }
 0x1ab   : > { %2418 = vrot.lane.b32.xlu1 %v2364_v46, %s5554_s17  ;;  %969 = vrot.lane.b32.xlu0 %v4227_v49, %s5554_s17 }
 0x1ad   : > { %v4235_v33 = vpop.permute.xlu0 %1015  ;;  %v4237_v34 = vpop.permute.xlu1 %1019 }
 0x1af   : > { %2390 = vrot.lane.b32.xlu1 %v2296_v56, %s5554_s17  ;;  %2370 = vrot.lane.b32.xlu0 %v2297_v3, %s5559_s26  ;;  %s5611_s17 = smov 112   ;;  %v2011_v3 = vcombine.low %v4173_v10, %v4186_v16  ;;  %v917_v56 = vcombine.high %v4178_v12, %v5556_v0 }
 0x1b1   : > { %v4253_v50 = vpop.permute.xlu0 %1023  ;;  %v4255_v51 = vpop.permute.xlu1 %1027 }
 0x1b2   : > { %v1039_v61 = vcombine.low %v4235_v33, %v4253_v50  ;;  %v1055_v62 = vcombine.low %v4237_v34, %v4255_v51 }
 0x1b3   : > { %921 = vrot.lane.b32.xlu1 %v848_v57, %s5559_s26  ;;  %1674 = vrot.lane.b32.xlu0 %v1641_v58, %s5559_s26  ;;  %v2027_v57 = vcombine.low %v4175_v11, %v4188_v17 }
 0x1b4   : > { %v4357_v60 = vrot.slane %v1055_v62, %v3894_v18  ;;  %v1779_v62 = vcombine.low %v4205_v27, %v4220_v41 }
 0x1b5   : > { %v4263_v43 = vpop.permute.xlu0 %1269  ;;  %v4265_v44 = vpop.permute.xlu1 %1273 }
 0x1b7   : > { %1662 = vrot.lane.b32.xlu1 %v1575_v52, %s5609_s29  ;;  %2378 = vrot.lane.b32.xlu0 %v2298_v59, %s5605_s19  ;;  %v4354_v59 = vrot.slane %v1039_v61, %v3894_v18  ;;  %v1764_v61 = vcombine.high %v4203_v26, %v4218_v40 }
 0x1b9   : > { %v4275_v1 = vpop.permute.xlu0 %1277  ;;  %v4277_v2 = vpop.permute.xlu1 %1281 }
 0x1ba   : > { %v1309_v63 = vcombine.low %v4265_v44, %v4277_v2 }
 0x1bb   : > { %929 = vrot.lane.b32.xlu1 %v849_v8, %s5605_s19  ;;  %2386 = vrot.lane.b32.xlu0 %v2299_v25, %s5609_s29  ;;  %v1293_v8 = vcombine.low %v4263_v43, %v4275_v1 }
 0x1bd   : > { %v4288_v31 = vpop.permute.xlu0 %2459  ;;  %v4290_v55 = vpop.permute.xlu1 %2463 }
 0x1bf   : > { %1670 = vrot.lane.b32.xlu1 %v1576_v37, %s5611_s17  ;;  %949 = vrot.lane.b32.xlu0 %v916_v30, %s5559_s26  ;;  %v4370_v30 = vrot.slane %v2011_v3, %v3894_v18  ;;  %v2028_v3 = vcombine.high %v4175_v11, %v4188_v17  ;;  %v4428_v11 = vrot.slane %v1764_v61, %v3894_v18 }
 0x1c1   : > { %v4298_v47 = vpop.permute.xlu0 %2467  ;;  %v4300_v13 = vpop.permute.xlu1 %2471  ;;  %v2042_v61 = vrot.slane %v2028_v3, %v3894_v18 }
 0x1c2   : > { %v2565_v9 = vcombine.low %v4290_v55, %v4300_v13 }
 0x1c3   : > { %937 = vrot.lane.b32.xlu1 %v850_v14, %s5609_s29  ;;  %1690 = vrot.lane.b32.xlu0 %v1643_v15, %s5609_s29  ;;  %v4373_v14 = vrot.slane %v2027_v57, %v3894_v18  ;;  %v2367_v15 = vcombine.high %v4194_v19, %v5556_v0  ;;  %v1072_v19 = vcombine.high %v4354_v59, %v4357_v60 }
 0x1c4   : > { %v4617_v42 = vrot.slane %v2565_v9, %v3894_v18 }
 0x1c5   : > { %v4313_v21 = vpop.permute.xlu0 %2713  ;;  %v4315_v22 = vpop.permute.xlu1 %2717  ;;  %v2044_v57 = vcombine.high %v4370_v30, %v4373_v14 }
 0x1c7   : > { %2398 = vrot.lane.b32.xlu1 %v2365_v29, %s5559_s26  ;;  %2422 = vrot.lane.b32.xlu0 %v2368_v39, %s5611_s17  ;;  %v1644_v29 = vcombine.high %v4197_v20, %v5556_v0  ;;  %v1763_v39 = vcombine.low %v4203_v26, %v4218_v40  ;;  %v4395_v20 = vrot.slane %v1309_v63, %v3894_v18  ;;  %s5616_s26 = smov 96  }
 0x1c8   : > { %v918_v26 = vcombine.high %v4209_v5, %v5556_v0 }
 0x1c9   : > { %v4326_v7 = vpop.permute.xlu0 %2721  ;;  %v4328_v28 = vpop.permute.xlu1 %2725  ;;  %v4416_v5 = vrot.slane %v1763_v39, %v3894_v18 }
 0x1ca   : > { %v2803_v46 = vcombine.low %v4313_v21, %v4326_v7  ;;  %v2819_v24 = vcombine.low %v4315_v22, %v4328_v28 }
 0x1cb   : > { %2406 = vrot.lane.b32.xlu1 %v2366_v35, %s5605_s19  ;;  %2394 = vrot.lane.b32.xlu0 %v2300_v36, %s5611_s17  ;;  %v1780_v35 = vcombine.high %v4205_v27, %v4220_v41  ;;  %v4392_v36 = vrot.slane %v1293_v8, %v3894_v18  ;;  %v2012_v41 = vcombine.high %v4173_v10, %v4186_v16 }
 0x1cc   : > { %v4348_v58 = vrot.slane %v2803_v46, %v3894_v18  ;;  %v4351_v52 = vrot.slane %v2819_v24, %v3894_v18 }
 0x1cd   : > { %v4363_v25 = vpop.permute.xlu0 %2457  ;;  %v4365_v12 = vpop.permute.xlu1 %2461  ;;  %v4431_v16 = vrot.slane %v1780_v35, %v3894_v18  ;;  %v1326_v17 = vcombine.high %v4392_v36, %v4395_v20  ;;  %v2026_v39 = vrot.slane %v2012_v41, %v3894_v18  ;;  %v4452_v35 = vrot.slane %v2044_v57, %v3899_v38 }
 0x1ce   : > { %5613 = vst [vmem:[#allocation21_spill] sm:$0xff] %v4348_v58  ;;  %5614 = vst [vmem:[#allocation22_spill] sm:$0xff] %v4351_v52 }
 0x1cf   : > { %1682 = vrot.lane.b32.xlu1 %v1642_v53, %s5605_s19  ;;  %957 = vrot.lane.b32.xlu0 %v917_v56, %s5605_s19  ;;  %v4419_v53 = vrot.slane %v1779_v62, %v3894_v18  ;;  %v4465_v3 = vrot.slane %v1326_v17, %v3899_v38  ;;  %v2059_v37 = vcombine.low %v2026_v39, %v2042_v61 }
 0x1d0   : > { %v1812_v45 = vcombine.high %v4428_v11, %v4431_v16 }
 0x1d1   : > { %v4397_v46 = vpop.permute.xlu0 %2465  ;;  %v4399_v24 = vpop.permute.xlu1 %2469  ;;  %v1796_v62 = vcombine.high %v4416_v5, %v4419_v53 }
 0x1d2   : > { %v2481_v40 = vcombine.low %v4363_v25, %v4397_v46  ;;  %v2497_v27 = vcombine.low %v4365_v12, %v4399_v24 }
 0x1d3   : > { %2414 = vrot.lane.b32.xlu1 %v2367_v15, %s5609_s29  ;;  %1698 = vrot.lane.b32.xlu0 %v1644_v29, %s5611_s17  ;;  %v4440_v15 = vrot.slane %v1072_v19, %v3899_v38  ;;  %v1811_v19 = vcombine.low %v4428_v11, %v4431_v16  ;;  %v2060_v29 = vcombine.high %v2026_v39, %v2042_v61 }
 0x1d4   : > { %v4422_v56 = vrot.slane %v2481_v40, %v3894_v18  ;;  %v4425_v10 = vrot.slane %v2497_v27, %v3894_v18  ;;  %v1040_v40 = vcombine.high %v4235_v33, %v4253_v50  ;;  %v1056_v27 = vcombine.high %v4237_v34, %v4255_v51 }
 0x1d5   : > { %v4435_v8 = vpop.permute.xlu0 %2711  ;;  %v4437_v63 = vpop.permute.xlu1 %2715  ;;  %v1294_v33 = vcombine.high %v4263_v43, %v4275_v1  ;;  %v1310_v34 = vcombine.high %v4265_v44, %v4277_v2  ;;  %v4492_v4 = vrot.slane %v1796_v62, %v3899_v38  ;;  %v4495_v43 = vrot.slane %v1811_v19, %v3899_v38 }
 0x1d6   : > { %v1054_v17 = vrot.slane %v1040_v40, %v3894_v18  ;;  %v1070_v39 = vrot.slane %v1056_v27, %v3894_v18  ;;  %v2514_v62 = vcombine.high %v4422_v56, %v4425_v10  ;;  %v4512_v27 = vrot.slane %v2059_v37, %v3899_v38 }
 0x1d7   : > { %965 = vrot.lane.b32.xlu0 %v918_v26, %s5609_s29  ;;  %1180 = vrot.lane.b32.xlu1 %v4440_v15, %s5568_s18  ;;  %v1324_v1 = vrot.slane %v1310_v34, %v3894_v18  ;;  %v2043_v44 = vcombine.low %v4370_v30, %v4373_v14  ;;  %v2482_v34 = vcombine.high %v4363_v25, %v4397_v46 }
 0x1d8   : > { %v1087_v2 = vcombine.low %v1054_v17, %v1070_v39  ;;  %v2498_v37 = vcombine.high %v4365_v12, %v4399_v24  ;;  %v4537_v14 = vrot.slane %v2514_v62, %v3899_v38 }
 0x1d9   : > { %v4460_v41 = vpop.permute.xlu0 %2719  ;;  %v4462_v26 = vpop.permute.xlu1 %2723  ;;  %v4546_v25 = vrot.slane %v2043_v44, %v3899_v38  ;;  %v4549_v12 = vrot.slane %v2482_v34, %v3894_v18 }
 0x1da   : > { %v2735_v57 = vcombine.low %v4435_v8, %v4460_v41  ;;  %v2751_v54 = vcombine.low %v4437_v63, %v4462_v26  ;;  %v4534_v30 = vrot.slane %v1087_v2, %v3899_v38  ;;  %5618 = vst [vmem:[#allocation25_spill] sm:$0xff] %v4537_v14  ;;  %v4555_v24 = vrot.slane %v2498_v37, %v3894_v18 }
 0x1db   : > { %2152 = vrot.lane.b32.xlu0 %v4452_v35, %s5568_s18  ;;  %1434 = vrot.lane.b32.xlu1 %v4465_v3, %s5568_s18  ;;  %5619 = vst [vmem:[#allocation26_spill] sm:$0xff] %v4546_v25  ;;  %v2736_v11 = vcombine.high %v4435_v8, %v4460_v41  ;;  %v2752_v16 = vcombine.high %v4437_v63, %v4462_v26  ;;  %v5622_v63 = vmov 0.0  }
 0x1dc   : > { %v4480_v50 = vrot.slane %v2735_v57, %v3894_v18  ;;  %v4483_v51 = vrot.slane %v2751_v54, %v3894_v18  ;;  %v1308_v54 = vrot.slane %v1294_v33, %v3894_v18  ;;  %v4515_v57 = vrot.slane %v2060_v29, %v3899_v38  ;;  %5617 = vst [vmem:[#allocation24_spill] sm:$0xff] %v4534_v30 }
 0x1dd   : > { %v4487_v61 = vpop.permute.xlu0 %1989  ;;  %v4489_v0 = vpop.permute.xlu1 %1993  ;;  %v4577_v8 = vrot.slane %v1812_v45, %v3899_v38  ;;  %v2075_v41 = vcombine.high %v4546_v25, %v5622_v63  ;;  %v1088_v26 = vcombine.high %v1054_v17, %v1070_v39  ;;  %v2549_v37 = vcombine.low %v4288_v31, %v4298_v47 }
 0x1de   : > { %5615 = vst [vmem:[#allocation23_spill] sm:$0xff] %v4483_v51  ;;  %v1341_v33 = vcombine.low %v1308_v54, %v1324_v1  ;;  %v2768_v29 = vcombine.high %v4480_v50, %v4483_v51  ;;  %v2529_v45 = vcombine.low %v4549_v12, %v4555_v24  ;;  %v4597_v17 = vrot.slane %v2752_v16, %v3894_v18 }
 0x1df   : > { %1904 = vrot.lane.b32.xlu0 %v4492_v4, %s5568_s18  ;;  %1912 = vrot.lane.b32.xlu1 %v4495_v43, %s5579_s16  ;;  %v4614_v16 = vrot.slane %v2549_v37, %v3894_v18 }
 0x1e0   : > { %v4552_v46 = vrot.slane %v1341_v33, %v3899_v38  ;;  %v4566_v44 = vrot.slane %v2768_v29, %v3899_v38 }
 0x1e1   : > { %v4507_v40 = vpop.permute.xlu0 %1997  ;;  %v4509_v19 = vpop.permute.xlu1 %2001 }
 0x1e2   : > { %5620 = vst [vmem:[#allocation27_spill] sm:$0xff] %v4552_v46  ;;  %5621 = vst [vmem:[#allocation28_spill] sm:$0xff] %v4566_v44 }
 0x1e3   : > { %2160 = vrot.lane.b32.xlu0 %v4512_v27, %s5579_s16  ;;  %2168 = vrot.lane.b32.xlu1 %v4515_v57, %s5616_s26 }
 0x1e5   : > { %v4529_v49 = vpop.permute.xlu0 %1741  ;;  %v4531_v48 = vpop.permute.xlu1 %1745 }
 0x1e7   : > { %1188 = vrot.lane.b32.xlu1 %v4534_v30, %s5579_s16  ;;  %2622 = vrot.lane.b32.xlu0 %v4537_v14, %s5568_s18 }
 0x1e9   : > { %v4561_v2 = vpop.permute.xlu0 %1749  ;;  %v4563_v62 = vpop.permute.xlu1 %1753 }
 0x1ea   : > { %v1831_v33 = vcombine.low %v4529_v49, %v4561_v2  ;;  %v1847_v34 = vcombine.low %v4531_v48, %v4563_v62 }
 0x1eb   : > { %1442 = vrot.lane.b32.xlu1 %v4552_v46, %s5579_s16  ;;  %2876 = vrot.lane.b32.xlu0 %v4566_v44, %s5568_s18  ;;  %v4594_v44 = vrot.slane %v2736_v11, %v3894_v18  ;;  %s5623_s18 = smov 16   ;;  %v1342_v11 = vcombine.high %v1308_v54, %v1324_v1  ;;  %v4611_v46 = vrot.slane %v1088_v26, %v3899_v38 }
 0x1ec   : > { %v4584_v29 = vrot.slane %v1831_v33, %v3894_v18  ;;  %v4587_v14 = vrot.slane %v1847_v34, %v3894_v18  ;;  %v1795_v34 = vcombine.low %v4416_v5, %v4419_v53  ;;  %v2582_v53 = vcombine.high %v4614_v16, %v4617_v42 }
 0x1ed   : > { %v4599_v39 = vpop.permute.xlu0 %1017  ;;  %v4601_v25 = vpop.permute.xlu1 %1021  ;;  %5624 = vst [vmem:[#allocation29_spill] sm:$0xff] %v4611_v46  ;;  %v2783_v33 = vcombine.low %v4594_v44, %v4597_v17  ;;  %v4633_v5 = vrot.slane %v1342_v11, %v3899_v38  ;;  %v2079_v54 = vcombine.low %v4487_v61, %v4507_v40  ;;  %v2095_v1 = vcombine.low %v4489_v0, %v4509_v19 }
 0x1ee   : > { %v4636_v9 = vrot.slane %v1795_v34, %v3899_v38  ;;  %v2550_v34 = vcombine.high %v4288_v31, %v4298_v47  ;;  %v2566_v11 = vcombine.high %v4290_v55, %v4300_v13 }
 0x1ef   : > { %1920 = vrot.lane.b32.xlu1 %v4577_v8, %s5616_s26  ;;  %2148 = vrot.lane.b32.xlu0 %v2075_v41, %s5623_s18  ;;  %v4626_v41 = vrot.slane %v2529_v45, %v3899_v38  ;;  %v4649_v45 = vrot.slane %v2783_v33, %v3899_v38  ;;  %v4664_v33 = vrot.slane %v2079_v54, %v3894_v18 }
 0x1f0   : > { %5626 = vst [vmem:[#allocation31_spill] sm:$0xff] %v4636_v9  ;;  %v4667_v31 = vrot.slane %v2095_v1, %v3894_v18  ;;  %v2076_v54 = vcombine.high %v4452_v35, %v5622_v63  ;;  %v2804_v1 = vcombine.high %v4313_v21, %v4326_v7 }
 0x1f1   : > { %v4621_v6 = vpop.permute.xlu0 %1025  ;;  %v4623_v30 = vpop.permute.xlu1 %1029  ;;  %5625 = vst [vmem:[#allocation30_spill] sm:$0xff] %v4626_v41  ;;  %5627 = vst [vmem:[#allocation32_spill] sm:$0xff] %v4649_v45 }
 0x1f2   : > { %v2112_v35 = vcombine.high %v4664_v33, %v4667_v31 }
 0x1f3   : > { %1196 = vrot.lane.b32.xlu1 %v4611_v46, %s5616_s26  ;;  %2630 = vrot.lane.b32.xlu0 %v4626_v41, %s5579_s16  ;;  %v1827_v41 = vcombine.high %v4636_v9, %v5622_v63  ;;  %v2836_v46 = vcombine.high %v4348_v58, %v4351_v52  ;;  %v4681_v9 = vrot.slane %v2550_v34, %v3894_v18 }
 0x1f5   : > { %v4644_v26 = vpop.permute.xlu0 %1271  ;;  %v4646_v37 = vpop.permute.xlu1 %1275  ;;  %v4710_v21 = vrot.slane %v2836_v46, %v3899_v38 }
 0x1f7   : > { %1450 = vrot.lane.b32.xlu1 %v4633_v5, %s5616_s26  ;;  %2884 = vrot.lane.b32.xlu0 %v4649_v45, %s5579_s16  ;;  %v4674_v45 = vrot.slane %v2582_v53, %v3899_v38  ;;  %s5629_s16 = smov 32   ;;  %v4689_v53 = vrot.slane %v2566_v11, %v3894_v18 }
 0x1f9   : > { %v4669_v47 = vpop.permute.xlu0 %1279  ;;  %v4671_v51 = vpop.permute.xlu1 %1283  ;;  %5628 = vst [vmem:[#allocation33_spill] sm:$0xff] %v4674_v45 }
 0x1fa   : > { %v1361_v55 = vcombine.low %v4644_v26, %v4669_v47  ;;  %v1377_v13 = vcombine.low %v4646_v37, %v4671_v51 }
 0x1fb   : > { %2650 = vrot.lane.b32.xlu1 %v4674_v45, %s5629_s16  ;;  %1900 = vrot.lane.b32.xlu0 %v1827_v41, %s5623_s18  ;;  %v2820_v45 = vcombine.high %v4315_v22, %v4328_v28  ;;  %v2530_v41 = vcombine.high %v4549_v12, %v4555_v24  ;;  %v1071_v22 = vcombine.low %v4354_v59, %v4357_v60 }
 0x1fc   : > { %v4694_v52 = vrot.slane %v1361_v55, %v3894_v18  ;;  %v4697_v34 = vrot.slane %v1377_v13, %v3894_v18  ;;  %v2597_v28 = vcombine.low %v4681_v9, %v4689_v53  ;;  %v4722_v12 = vrot.slane %v2804_v1, %v3894_v18 }
 0x1fd   : > { %v4705_v11 = vpop.permute.xlu0 %1650  ;;  %v4707_v58 = vpop.permute.xlu1 %1658  ;;  %v4725_v46 = vrot.slane %v2820_v45, %v3894_v18  ;;  %v2784_v24 = vcombine.high %v4594_v44, %v4597_v17  ;;  %v4737_v59 = vrot.slane %v2112_v35, %v3899_v38  ;;  %v2080_v60 = vcombine.high %v4487_v61, %v4507_v40 }
 0x1fe   : > { %v2096_v44 = vcombine.high %v4489_v0, %v4509_v19  ;;  %v4748_v17 = vrot.slane %v1071_v22, %v3899_v38  ;;  %v1325_v45 = vcombine.low %v4392_v36, %v4395_v20  ;;  %v4762_v61 = vrot.slane %v2597_v28, %v3899_v38 }
 0x1ff   : > { %2904 = vrot.lane.b32.xlu1 %v4710_v21, %s5629_s16  ;;  %2156 = vrot.lane.b32.xlu0 %v2076_v54, %s5605_s19  ;;  %v4734_v54 = vrot.slane %v2530_v41, %v3899_v38  ;;  %v2851_v1 = vcombine.low %v4722_v12, %v4725_v46  ;;  %v4759_v7 = vrot.slane %v2784_v24, %v3899_v38 }
 0x200   : > { %5631 = vst [vmem:[#allocation35_spill] sm:$0xff] %v4748_v17  ;;  %5633 = vst [vmem:[#allocation37_spill] sm:$0xff] %v4762_v61  ;;  %v4769_v0 = vrot.slane %v2080_v60, %v3894_v18  ;;  %v4772_v36 = vrot.slane %v2096_v44, %v3894_v18  ;;  %v1864_v20 = vcombine.high %v4584_v29, %v4587_v14 }
 0x201   : > { %v4729_v55 = vpop.permute.xlu0 %2374  ;;  %v4731_v13 = vpop.permute.xlu1 %925  ;;  %5632 = vst [vmem:[#allocation36_spill] sm:$0xff] %v4759_v7  ;;  %v1103_v22 = vcombine.high %v4748_v17, %v5622_v63  ;;  %v4783_v28 = vrot.slane %v2851_v1, %v3899_v38  ;;  %v4786_v24 = vrot.slane %v1325_v45, %v3899_v38  ;;  %v1108_v44 = vcombine.high %v4599_v39, %v4621_v6 }
 0x202   : > { %5630 = vst [vmem:[#allocation34_spill] sm:$0xff] %v4731_v13  ;;  %v2127_v60 = vcombine.low %v4769_v0, %v4772_v36  ;;  %v2598_v17 = vcombine.high %v4681_v9, %v4689_v53  ;;  %v1362_v53 = vcombine.high %v4644_v26, %v4669_v47  ;;  %v1848_v26 = vcombine.high %v4531_v48, %v4563_v62 }
 0x203   : > { %2638 = vrot.lane.b32.xlu0 %v4734_v54, %s5616_s26  ;;  %2180 = vrot.lane.b32.xlu1 %v4737_v59, %s5629_s16  ;;  %5636 = vst [vmem:[#allocation39_spill] sm:$0xff] %v4783_v28  ;;  %5637 = vst [vmem:[#allocation40_spill] sm:$0xff] %v4786_v24  ;;  %v1357_v45 = vcombine.high %v4786_v24, %v5622_v63  ;;  %v1828_v24 = vcombine.high %v4492_v4, %v5622_v63 }
 0x204   : > { %v2077_v4 = vcombine.high %v4512_v27, %v5622_v63  ;;  %v1376_v27 = vrot.slane %v1362_v53, %v3894_v18 }
 0x205   : > { %v4754_v41 = vpop.permute.xlu0 %1646  ;;  %v4756_v35 = vpop.permute.xlu1 %1666 }
 0x207   : > { %2892 = vrot.lane.b32.xlu0 %v4759_v7, %s5616_s26  ;;  %2658 = vrot.lane.b32.xlu1 %v4762_v61, %s5634_s0  ;;  %v1107_v7 = vcombine.low %v4599_v39, %v4621_v6  ;;  %v1122_v61 = vrot.slane %v1108_v44, %v3894_v18 }
 0x209   : > { %v4776_v40 = vpop.permute.xlu0 %2382  ;;  %v4778_v19 = vpop.permute.xlu1 %933 }
 0x20a   : > { %5635 = vst [vmem:[#allocation38_spill] sm:$0xff] %v4778_v19  ;;  %v1124_v19 = vcombine.high %v4601_v25, %v4623_v30 }
 0x20b   : > { %1176 = vrot.lane.b32.xlu0 %v1103_v22, %s5623_s18  ;;  %2912 = vrot.lane.b32.xlu1 %v4783_v28, %s5634_s0  ;;  %v4804_v22 = vrot.slane %v1864_v20, %v3899_v38  ;;  %v1123_v28 = vcombine.low %v4601_v25, %v4623_v30  ;;  %v4818_v20 = vrot.slane %v2127_v60, %v3899_v38 }
 0x20c   : > { %v1138_v9 = vrot.slane %v1124_v19, %v3894_v18  ;;  %v4836_v30 = vrot.slane %v2598_v17, %v3899_v38  ;;  %v2852_v25 = vcombine.high %v4722_v12, %v4725_v46 }
 0x20d   : > { %v4797_v13 = vpop.permute.xlu0 %1654  ;;  %v4799_v1 = vpop.permute.xlu1 %2402  ;;  %v4848_v47 = vrot.slane %v1123_v28, %v3894_v18 }
 0x20e   : > { %v1155_v19 = vcombine.low %v1122_v61, %v1138_v9 }
 0x20f   : > { %1430 = vrot.lane.b32.xlu0 %v1357_v45, %s5623_s18  ;;  %1932 = vrot.lane.b32.xlu1 %v4804_v22, %s5629_s16  ;;  %v1378_v45 = vcombine.high %v4646_v37, %v4671_v51  ;;  %v1832_v51 = vcombine.high %v4529_v49, %v4561_v2  ;;  %v4845_v37 = vrot.slane %v1107_v7, %v3894_v18 }
 0x210   : > { %v4861_v49 = vrot.slane %v2852_v25, %v3899_v38  ;;  %v1862_v2 = vrot.slane %v1848_v26, %v3894_v18  ;;  %v4871_v60 = vrot.slane %v1155_v19, %v3899_v38  ;;  %v1156_v26 = vcombine.high %v1122_v61, %v1138_v9 }
 0x211   : > { %v4826_v6 = vpop.permute.xlu0 %953  ;;  %v4828_v39 = vpop.permute.xlu1 %1678  ;;  %v1392_v17 = vrot.slane %v1378_v45, %v3894_v18  ;;  %v1846_v48 = vrot.slane %v1832_v51, %v3894_v18  ;;  %v1140_v62 = vcombine.high %v4845_v37, %v4848_v47  ;;  %v1394_v18 = vcombine.high %v4694_v52, %v4697_v34 }
 0x212   : > { %5638 = vst [vmem:[#allocation41_spill] sm:$0xff] %v4861_v49 }
 0x213   : > { %1908 = vrot.lane.b32.xlu0 %v1828_v24, %s5605_s19  ;;  %2188 = vrot.lane.b32.xlu1 %v4818_v20, %s5634_s0  ;;  %v1409_v7 = vcombine.low %v1376_v27, %v1392_v17  ;;  %v1880_v44 = vcombine.high %v1846_v48, %v1862_v2  ;;  %v1879_v51 = vcombine.low %v1846_v48, %v1862_v2 }
 0x214   : > { %v2128_v48 = vcombine.high %v4769_v0, %v4772_v36  ;;  %v1410_v61 = vcombine.high %v1376_v27, %v1392_v17 }
 0x215   : > { %v4852_v24 = vpop.permute.xlu0 %1694  ;;  %v4854_v12 = vpop.permute.xlu1 %2410  ;;  %v4887_v25 = vrot.slane %v1409_v7, %v3899_v38  ;;  %v4912_v7 = vrot.slane %v1156_v26, %v3899_v38 }
 0x216   : > { %v4927_v17 = vrot.slane %v1410_v61, %v3899_v38  ;;  %v1104_v61 = vcombine.high %v4440_v15, %v5622_v63 }
 0x217   : > { %2164 = vrot.lane.b32.xlu0 %v2077_v4, %s5609_s29  ;;  %2666 = vrot.lane.b32.xlu1 %v4836_v30, %s5616_s26  ;;  %v4884_v4 = vrot.slane %v1140_v62, %v3899_v38  ;;  %v4899_v62 = vrot.slane %v1394_v18, %v3899_v38  ;;  %v1701_v18 = vsel %vm976_vm5, %v4100_v32, %v4754_v41 }
 0x218   : > { %v1702_v0 = vsel %vm978_vm6, %v1701_v18, %v4705_v11  ;;  %v2581_v11 = vcombine.low %v4614_v16, %v4617_v42 }
 0x219   : > { %v4866_v46 = vpop.permute.xlu0 %961  ;;  %v4868_v28 = vpop.permute.xlu1 %1686  ;;  %v1703_v32 = vsel %vm980_vm7, %v1702_v0, %v4797_v13  ;;  %v1830_v13 = vcombine.high %v4577_v8, %v5622_v63  ;;  %v1360_v0 = vcombine.high %v4633_v5, %v5622_v63  ;;  %v1358_v8 = vcombine.high %v4465_v3, %v5622_v63 }
 0x21a   : > { %v1704_v41 = vsel %vm982_vm8, %v1703_v32, %v4707_v58  ;;  %v4958_v15 = vrot.slane %v2581_v11, %v3899_v38 }
 0x21b   : > { %2920 = vrot.lane.b32.xlu1 %v4861_v49, %s5616_s26  ;;  %1216 = vrot.lane.b32.xlu0 %v4871_v60, %s5634_s0 }
 0x21c   : > { %v2613_v3 = vcombine.high %v4958_v15, %v5622_v63 }
 0x21d   : > { %v4879_v53 = vpop.permute.xlu0 %969  ;;  %v4881_v45 = vpop.permute.xlu1 %2418 }
 0x21e   : > { %5639 = vst [vmem:[#allocation42_spill] sm:$0xff] %v4879_v53  ;;  %v4896_v53 = vrot.slane %v1880_v44, %v3899_v38  ;;  %v4915_v44 = vrot.slane %v1879_v51, %v3899_v38  ;;  %v4930_v51 = vrot.slane %v2128_v48, %v3899_v38 }
 0x21f   : > { %1208 = vrot.lane.b32.xlu1 %v4884_v4, %s5629_s16  ;;  %1470 = vrot.lane.b32.xlu0 %v4887_v25, %s5634_s0 }
 0x221   : > { %v2371_v19 = vpop.permute.xlu0 %2370  ;;  %v4893_v49 = vpop.permute.xlu1 %2390 }
 0x223   : > { %1948 = vrot.lane.b32.xlu0 %v4896_v53, %s5616_s26  ;;  %1462 = vrot.lane.b32.xlu1 %v4899_v62, %s5629_s16 }
 0x225   : > { %v4907_v9 = vpop.permute.xlu0 %1674  ;;  %v4909_v2 = vpop.permute.xlu1 %921 }
 0x227   : > { %1224 = vrot.lane.b32.xlu0 %v4912_v7, %s5616_s26  ;;  %1940 = vrot.lane.b32.xlu1 %v4915_v44, %s5634_s0 }
 0x229   : > { %v2379_v36 = vpop.permute.xlu0 %2378  ;;  %v1663_v27 = vpop.permute.xlu1 %1662 }
 0x22a   : > { %v1705_v18 = vsel %vm984_vm9, %v1704_v41, %v1663_v27  ;;  %v2425_v27 = vsel %vm976_vm5, %v4230_v23, %v2371_v19  ;;  %v1829_v23 = vcombine.high %v4495_v43, %v5622_v63  ;;  %v5640_v19 = vcombine.low %v4422_v56, %v4425_v10  ;;  %v5641_v10 = vld [vmem:[#allocation23_spill] sm:$0xff] }
 0x22b   : > { %1478 = vrot.lane.b32.xlu0 %v4927_v17, %s5616_s26  ;;  %2196 = vrot.lane.b32.xlu1 %v4930_v51, %s5616_s26  ;;  %v1706_v58 = vsel %vm986_vm10, %v1705_v18, %v4756_v35  ;;  %v2426_v35 = vsel %vm978_vm6, %v2425_v27, %v4729_v55  ;;  %v2078_v55 = vcombine.high %v4515_v57, %v5622_v63  ;;  %v5643_v27 = vld [vmem:[#allocation24_spill] sm:$0xff] }
 0x22c   : > { %v4977_v11 = vrot.slane %v5640_v19, %v3899_v38  ;;  %v2111_v18 = vcombine.low %v4664_v33, %v4667_v31 }
 0x22d   : > { %v2387_v26 = vpop.permute.xlu0 %2386  ;;  %v4942_v48 = vpop.permute.xlu1 %929 }
 0x22e   : > { %v2545_v56 = vcombine.high %v4977_v11, %v5622_v63 }
 0x22f   : > { %1924 = vrot.lane.b32.xlu0 %v1830_v13, %s5611_s17  ;;  %1184 = vrot.lane.b32.xlu1 %v1104_v61, %s5605_s19  ;;  %v2427_v61 = vsel %vm980_vm7, %v2426_v35, %v2379_v36  ;;  %v5642_v36 = vcombine.low %v4480_v50, %v5641_v10  ;;  %v5006_v50 = vrot.slane %v2111_v18, %v3899_v38  ;;  %v5645_v35 = vld [vmem:[#allocation20_spill] sm:$0xff]  ;;  %v5646_v18 = vld [vmem:[#allocation27_spill] sm:$0xff] }
 0x230   : > { %v2428_v43 = vsel %vm982_vm8, %v2427_v61, %v4776_v40 }
 0x231   : > { %v950_v42 = vpop.permute.xlu0 %949  ;;  %v1671_v16 = vpop.permute.xlu1 %1670 }
 0x232   : > { %v1707_v32 = vsel %vm988_vm11, %v1706_v58, %v1671_v16 }
 0x233   : > { %v1717_v41 = vrot.slane %v1707_v32, 4  ;;  %1454 = vrot.lane.b32.xlu0 %v1360_v0, %s5611_s17  ;;  %1438 = vrot.lane.b32.xlu1 %v1358_v8, %s5605_s19  ;;  %v4994_v0 = vrot.slane %v5642_v36, %v3899_v38  ;;  %v2429_v8 = vsel %vm984_vm9, %v2428_v43, %v2387_v26  ;;  %v1105_v32 = vcombine.high %v5643_v27, %v5622_v63  ;;  %v5644_v26 = vld [vmem:[#allocation18_spill] sm:$0xff] }
 0x234   : > { %v2430_v33 = vsel %vm986_vm10, %v2429_v8, %v4893_v49  ;;  %v1359_v43 = vcombine.high %v5646_v18, %v5622_v63  ;;  %v5648_v8 = vld [vmem:[#allocation29_spill] sm:$0xff] }
 0x235   : > { %1721 = vst [vmem:[#allocation3 + $0x18] sm:$0xf0] %v1717_v41  ;;  %v1691_v5 = vpop.permute.xlu0 %1690  ;;  %v4967_v13 = vpop.permute.xlu1 %937  ;;  %v2799_v40 = vcombine.high %v4994_v0, %v5622_v63  ;;  %v1708_v41 = vsel %vm976_vm5, %v5644_v26, %v4907_v9  ;;  %v2143_v9 = vcombine.high %v5006_v50, %v5622_v63 }
 0x236   : > { %v1709_v61 = vsel %vm978_vm6, %v1708_v41, %v4828_v39  ;;  %v5652_v41 = vld [vmem:[#allocation25_spill] sm:$0xff] }
 0x237   : > { %2646 = vrot.lane.b32.xlu0 %v2613_v3, %s5623_s18  ;;  %1916 = vrot.lane.b32.xlu1 %v1829_v23, %s5609_s29 }
 0x239   : > { %v2423_v58 = vpop.permute.xlu0 %2422  ;;  %v2399_v16 = vpop.permute.xlu1 %2398 }
 0x23a   : > { %v2432_v3 = vsel %vm976_vm5, %v5645_v35, %v2399_v16  ;;  %v5647_v16 = vld [vmem:[#allocation19_spill] sm:$0xff]  ;;  %v2546_v35 = vcombine.high %v5652_v41, %v5622_v63 }
 0x23b   : > { %2618 = vrot.lane.b32.xlu0 %v2545_v56, %s5623_s18  ;;  %2172 = vrot.lane.b32.xlu1 %v2078_v55, %s5611_s17  ;;  %v2433_v49 = vsel %vm978_vm6, %v2432_v3, %v4799_v1  ;;  %v990_v56 = vsel %vm976_vm5, %v5647_v16, %v950_v42 }
 0x23d   : > { %v2395_v57 = vpop.permute.xlu0 %2394  ;;  %v2407_v31 = vpop.permute.xlu1 %2406 }
 0x23e   : > { %v2431_v23 = vsel %vm988_vm11, %v2430_v33, %v2395_v57  ;;  %v2434_v10 = vsel %vm980_vm7, %v2433_v49, %v2407_v31  ;;  %v1106_v57 = vcombine.high %v5648_v8, %v5622_v63  ;;  %v5649_v33 = vld [vmem:[#allocation21_spill] sm:$0xff]  ;;  %v991_v31 = vsel %vm978_vm6, %v990_v56, %v4826_v6  ;;  %v5654_v56 = vld [vmem:[#allocation30_spill] sm:$0xff] }
 0x23f   : > { %2439 = vst [vmem:[#allocation3 + $0x8] sm:$0xf] %v2431_v23  ;;  %2872 = vrot.lane.b32.xlu0 %v2799_v40, %s5623_s18  ;;  %1192 = vrot.lane.b32.xlu1 %v1105_v32, %s5609_s29  ;;  %v5650_v40 = vld [vmem:[#allocation22_spill] sm:$0xff]  ;;  %v2435_v26 = vsel %vm982_vm8, %v2434_v10, %v4854_v12  ;;  %v2547_v10 = vcombine.high %v5654_v56, %v5622_v63 }
 0x240   : > { %v5651_v42 = vcombine.low %v5649_v33, %v5650_v40  ;;  %v5657_v40 = vcombine.low %v4584_v29, %v4587_v14 }
 0x241   : > { %v958_v19 = vpop.permute.xlu0 %957  ;;  %v1683_v55 = vpop.permute.xlu1 %1682 }
 0x242   : > { %v1710_v36 = vsel %vm980_vm7, %v1709_v61, %v1683_v55  ;;  %v5039_v27 = vrot.slane %v5651_v42, %v3899_v38  ;;  %v992_v3 = vsel %vm980_vm7, %v991_v31, %v958_v19  ;;  %v5095_v42 = vrot.slane %v5657_v40, %v3899_v38 }
 0x243   : > { %v1711_v1 = vsel %vm982_vm8, %v1710_v36, %v4868_v28  ;;  %2176 = vrot.lane.b32.xlu0 %v2143_v9, %s5623_s18  ;;  %1446 = vrot.lane.b32.xlu1 %v1359_v43, %s5609_s29  ;;  %v993_v12 = vsel %vm982_vm8, %v992_v3, %v4866_v46  ;;  %v5653_v9 = vld [vmem:[#allocation28_spill] sm:$0xff]  ;;  %v5655_v36 = vld [vmem:[#allocation33_spill] sm:$0xff]  ;;  %v1172_v3 = vcombine.high %v4884_v4, %v5622_v63 }
 0x244   : > { %v1712_v39 = vsel %vm984_vm9, %v1711_v1, %v1691_v5  ;;  %v2800_v18 = vcombine.high %v5653_v9, %v5622_v63  ;;  %v2614_v1 = vcombine.high %v5655_v36, %v5622_v63  ;;  %v5660_v4 = vcombine.low %v4694_v52, %v4697_v34 }
 0x245   : > { %v1699_v32 = vpop.permute.xlu0 %1698  ;;  %v1713_v28 = vsel %vm986_vm10, %v1712_v39, %v4852_v24  ;;  %v2415_v5 = vpop.permute.xlu1 %2414 }
 0x246   : > { %v1714_v23 = vsel %vm988_vm11, %v1713_v28, %v1699_v32  ;;  %v2436_v49 = vsel %vm984_vm9, %v2435_v26, %v2415_v5  ;;  %v2548_v26 = vcombine.high %v4734_v54, %v5622_v63  ;;  %v2144_v5 = vcombine.high %v4737_v59, %v5622_v63 }
 0x247   : > { %v1718_v61 = vrot.slane %v1714_v23, 4  ;;  %v2437_v6 = vsel %vm986_vm10, %v2436_v49, %v4881_v45  ;;  %2626 = vrot.lane.b32.xlu0 %v2546_v35, %s5605_s19  ;;  %1200 = vrot.lane.b32.xlu1 %v1106_v57, %s5611_s17  ;;  %v2867_v45 = vcombine.high %v5039_v27, %v5622_v63  ;;  %v5656_v57 = vld [vmem:[#allocation32_spill] sm:$0xff]  ;;  %v5658_v23 = vld [vmem:[#allocation37_spill] sm:$0xff] }
 0x248   : > { %v2438_v24 = vsel %vm988_vm11, %v2437_v6, %v2423_v58  ;;  %v1139_v58 = vcombine.low %v4845_v37, %v4848_v47  ;;  %v2801_v37 = vcombine.high %v5656_v57, %v5622_v63  ;;  %v2868_v47 = vcombine.high %v4710_v21, %v5622_v63  ;;  %v5659_v6 = vld [vmem:[#allocation39_spill] sm:$0xff] }
 0x249   : > { %1722 = vst [vmem:[#allocation3 + $0x10] sm:$0xf0] %v1718_v61  ;;  %2440 = vst [vmem:[#allocation3 + $0x20] sm:$0xf] %v2438_v24  ;;  %v966_v19 = vpop.permute.xlu0 %965  ;;  %v5059_v55 = vpop.permute.xlu1 %1180  ;;  %v1895_v21 = vcombine.high %v5095_v42, %v5622_v63  ;;  %v2615_v49 = vcombine.high %v5658_v23, %v5622_v63  ;;  %v1426_v61 = vcombine.high %v4899_v62, %v5622_v63 }
 0x24a   : > { %v5066_v43 = vsel %vm984_vm9, %v993_v12, %v966_v19  ;;  %v5089_v33 = vrot.slane %v1139_v58, %v3899_v38  ;;  %v2869_v24 = vcombine.high %v5659_v6, %v5622_v63  ;;  %v5137_v12 = vrot.slane %v5660_v4, %v3899_v38  ;;  %v5661_v19 = vld [vmem:[#allocation26_spill] sm:$0xff]  ;;  %v5665_v6 = vld [vmem:[#allocation15_spill] sm:$0xff] }
 0x24b   : > { %2880 = vrot.lane.b32.xlu0 %v2800_v18, %s5605_s19  ;;  %2900 = vrot.lane.b32.xlu1 %v2867_v45, %s5623_s18  ;;  %v1897_v58 = vcombine.high %v4915_v44, %v5622_v63  ;;  %v2145_v57 = vcombine.high %v4818_v20, %v5622_v63 }
 0x24c   : > { %v1171_v28 = vcombine.high %v5089_v33, %v5622_v63  ;;  %v1425_v52 = vcombine.high %v5137_v12, %v5622_v63 }
 0x24d   : > { %v2153_v46 = vpop.permute.xlu0 %2152  ;;  %v5072_v16 = vpop.permute.xlu1 %1434 }
 0x24f   : > { %2634 = vrot.lane.b32.xlu0 %v2547_v10, %s5609_s29  ;;  %2654 = vrot.lane.b32.xlu1 %v2614_v1, %s5605_s19  ;;  %v1896_v10 = vcombine.high %v4804_v22, %v5622_v63  ;;  %v1173_v1 = vcombine.high %v4871_v60, %v5622_v63  ;;  %v1427_v22 = vcombine.high %v4887_v25, %v5622_v63  ;;  %v5662_v25 = vld [vmem:[#allocation41_spill] sm:$0xff] }
 0x251   : > { %v5080_v39 = vpop.permute.xlu0 %1904  ;;  %v5082_v8 = vpop.permute.xlu1 %1912 }
 0x253   : > { %2888 = vrot.lane.b32.xlu0 %v2801_v37, %s5609_s29  ;;  %2908 = vrot.lane.b32.xlu1 %v2868_v47, %s5605_s19  ;;  %v2616_v47 = vcombine.high %v4836_v30, %v5622_v63 }
 0x255   : > { %v2161_v31 = vpop.permute.xlu0 %2160  ;;  %v5099_v32 = vpop.permute.xlu1 %2168 }
 0x257   : > { %1204 = vrot.lane.b32.xlu0 %v1171_v28, %s5623_s18  ;;  %1928 = vrot.lane.b32.xlu1 %v1895_v21, %s5623_s18  ;;  %v1898_v21 = vcombine.high %v4896_v53, %v5622_v63 }
 0x259   : > { %v5107_v14 = vpop.permute.xlu0 %2622  ;;  %v5109_v29 = vpop.permute.xlu1 %1188 }
 0x25b   : > { %2642 = vrot.lane.b32.xlu0 %v2548_v26, %s5611_s17  ;;  %2184 = vrot.lane.b32.xlu1 %v2144_v5, %s5605_s19  ;;  %v2870_v26 = vcombine.high %v5662_v25, %v5622_v63 }
 0x25d   : > { %v5117_v41 = vpop.permute.xlu0 %2876  ;;  %v5119_v35 = vpop.permute.xlu1 %1442 }
 0x25f   : > { %1212 = vrot.lane.b32.xlu0 %v1172_v3, %s5605_s19  ;;  %2662 = vrot.lane.b32.xlu1 %v2615_v49, %s5609_s29  ;;  %v5663_v3 = vld [vmem:[#allocation36_spill] sm:$0xff] }
 0x260   : > { %v2802_v23 = vcombine.high %v5663_v3, %v5622_v63 }
 0x261   : > { %v2149_v54 = vpop.permute.xlu0 %2148  ;;  %v5127_v59 = vpop.permute.xlu1 %1920 }
 0x262   : > { %v2203_v9 = vsel %vm976_vm5, %v5661_v19, %v2149_v54  ;;  %v1428_v54 = vcombine.high %v4927_v17, %v5622_v63 }
 0x263   : > { %1466 = vrot.lane.b32.xlu0 %v1426_v61, %s5605_s19  ;;  %2916 = vrot.lane.b32.xlu1 %v2869_v24, %s5609_s29  ;;  %v2204_v18 = vsel %vm978_vm6, %v2203_v9, %v2153_v46  ;;  %v2146_v46 = vcombine.high %v4930_v51, %v5622_v63  ;;  %v5664_v61 = vld [vmem:[#allocation14_spill] sm:$0xff] }
 0x264   : > { %v5666_v24 = vcombine.high %v5664_v61, %v5665_v6 }
 0x265   : > { %v5144_v45 = vpop.permute.xlu0 %2630  ;;  %v5146_v62 = vpop.permute.xlu1 %1196 }
 0x266   : > { %v847_v4 = vrot.slane %v5666_v24, %v3899_v38  ;;  %v3044_v38 = vld [vmem:[%s5541_s7] sm:$0xff] }
 0x267   : > { %1944 = vrot.lane.b32.xlu0 %v1897_v58, %s5609_s29  ;;  %1458 = vrot.lane.b32.xlu1 %v1425_v52, %s5623_s18  ;;  %v5668_v52 = vld [vmem:[#allocation31_spill] sm:$0xff]  ;;  %s3731_s18 = smov [#allocation4]  }
 0x268   : > { %v851_v58 = vcombine.high %v847_v4, %v5622_v63 }
 0x269   : > { %v5154_v34 = vpop.permute.xlu0 %2884  ;;  %v5156_v56 = vpop.permute.xlu1 %1450 }
 0x26b   : > { %2200 = vrot.lane.b32.xlu0 %v2146_v46, %s5611_s17  ;;  %1936 = vrot.lane.b32.xlu1 %v1896_v10, %s5605_s19  ;;  %s5414_s19 = sshll.u32 %s3821_s25, 8 }
 0x26c   : > { %s3237_s16 = scalar_lea.hbm %s5543_s9, %s5414_s19 }
 0x26d   : > { %v1901_v44 = vpop.permute.xlu0 %1900  ;;  %v5164_v36 = vpop.permute.xlu1 %2650 }
 0x26e   : > { %v1955_v17 = vsel %vm976_vm5, %v5668_v52, %v1901_v44 }
 0x26f   : > { %1220 = vrot.lane.b32.xlu0 %v1173_v1, %s5609_s29  ;;  %2192 = vrot.lane.b32.xlu1 %v2145_v57, %s5609_s29  ;;  %v1956_v46 = vsel %vm978_vm6, %v1955_v17, %v5080_v39 }
 0x271   : > { %v2157_v51 = vpop.permute.xlu0 %2156  ;;  %v5172_v37 = vpop.permute.xlu1 %2904 }
 0x272   : > { %v2205_v40 = vsel %vm980_vm7, %v2204_v18, %v2157_v51  ;;  %v3127_v51 = vld [vmem:[%s5542_s8] sm:$0xff] }
 0x273   : > { %1474 = vrot.lane.b32.xlu0 %v1427_v22, %s5609_s29  ;;  %2670 = vrot.lane.b32.xlu1 %v2616_v47, %s5611_s17  ;;  %v2206_v20 = vsel %vm982_vm8, %v2205_v40, %v2161_v31  ;;  %v1174_v31 = vcombine.high %v4912_v7, %v5622_v63  ;;  %v5667_v7 = vld [vmem:[#allocation16_spill] sm:$0xff] }
 0x274   : > { %v919_v19 = vcombine.high %v5667_v7, %v5622_v63 }
 0x275   : > { %v5182_v60 = vpop.permute.xlu0 %2638  ;;  %v5184_v28 = vpop.permute.xlu1 %2180 }
 0x277   : > { %1952 = vrot.lane.b32.xlu0 %v1898_v21, %s5611_s17  ;;  %2924 = vrot.lane.b32.xlu1 %v2870_v26, %s5611_s17  ;;  %v2954_v21 = vld [vmem:[%s5669_s6] sm:$0xff] }
 0x279   : > { %v5192_v30 = vpop.permute.xlu0 %2892  ;;  %v5194_v5 = vpop.permute.xlu1 %2658 }
 0x27b   : > { %1228 = vrot.lane.b32.xlu0 %v1174_v31, %s5611_s17  ;;  %2896 = vrot.lane.b32.xlu1 %v2802_v23, %s5611_s17 }
 0x27d   : > { %v1177_v53 = vpop.permute.xlu0 %1176  ;;  %v5202_v49 = vpop.permute.xlu1 %2912 }
 0x27f   : > { %1482 = vrot.lane.b32.xlu0 %v1428_v54, %s5611_s17  ;;  %941 = vrot.lane.b32.xlu1 %v847_v4, %s5616_s26  ;;  %s3239_s26 = sshll.u32 %s3926_s20, 4  ;;  %s3240_s26 = int_to_ptr.vmem [resolvable:$true] %s3239_s26 }
 0x281   : > { %v1431_v9 = vpop.permute.xlu0 %1430  ;;  %v5214_v18 = vpop.permute.xlu1 %1932 }
 0x283   : > { %973 = vrot.lane.b32.xlu0 %v919_v19, %s5611_s17  ;;  %945 = vrot.lane.b32.xlu1 %v851_v58, %s5611_s17  ;;  %s3573_s17 = sshll.u32 %s3731_s18, 4  ;;  %s3574_s17 = int_to_ptr.vmem [resolvable:$false] %s3573_s17 }
 0x284   : > { %p3576_p0 = scmp.lt.s32.totalorder %s3240_s26, %s3574_s17 }
 0x285   : > { %v1909_v10 = vpop.permute.xlu0 %1908  ;;  %v5226_v1 = vpop.permute.xlu1 %2188 }
 0x286   : > { %v1957_v57 = vsel %vm980_vm7, %v1956_v46, %v1909_v10 }
 0x287   : > { %3047 = vperm.xlu1 %3546, %v3044_v38   ;;  %v1958_v44 = vsel %vm982_vm8, %v1957_v57, %v5082_v8  ;;  %2957 = vperm.xlu0 %3547, %v2954_v21   ;;  %v5670_v57 = vld [vmem:[#allocation35_spill] sm:$0xff] }
 0x289   : > { %v2165_v22 = vpop.permute.xlu0 %2164  ;;  %v5234_v47 = vpop.permute.xlu1 %2666 }
 0x28a   : > { %v2207_v40 = vsel %vm984_vm9, %v2206_v20, %v2165_v22  ;;  %v5671_v22 = vld [vmem:[#allocation40_spill] sm:$0xff] }
 0x28b   : > { %3130 = vperm.xlu1 %3546, %v3127_v51   ;;  %v2208_v39 = vsel %vm986_vm10, %v2207_v40, %v5099_v32  ;;  %v1231_v51 = vsel %vm976_vm5, %v5670_v57, %v1177_v53  ;;  %v1485_v40 = vsel %vm976_vm5, %v5671_v22, %v1431_v9 }
 0x28d   : > { %v5242_v25 = vpop.permute.xlu0 %1216  ;;  %v5244_v8 = vpop.permute.xlu1 %2920 }
 0x291   : > { %v5246_v26 = vpop.permute.xlu0 %1470  ;;  %v5248_v31 = vpop.permute.xlu1 %1208 }
 0x295   : > { %v5250_v3 = vpop.permute.xlu0 %1948  ;;  %v5252_v20 = vpop.permute.xlu1 %1462 }
 0x299   : > { %v5254_v23 = vpop.permute.xlu0 %1224  ;;  %v5256_v32 = vpop.permute.xlu1 %1940 }
 0x29d   : > { %v5258_v54 = vpop.permute.xlu0 %1478  ;;  %v5260_v61 = vpop.permute.xlu1 %2196 }
 0x2a1   : > { %v1925_v6 = vpop.permute.xlu0 %1924  ;;  %v1185_v24 = vpop.permute.xlu1 %1184 }
 0x2a5   : > { %v1455_v4 = vpop.permute.xlu0 %1454  ;;  %v1439_v7 = vpop.permute.xlu1 %1438 }
 0x2a9   : > { %v2647_v19 = vpop.permute.xlu0 %2646  ;;  %v1917_v58 = vpop.permute.xlu1 %1916 }
 0x2aa   : > { %v1959_v52 = vsel %vm984_vm9, %v1958_v44, %v1917_v58  ;;  %v1232_v44 = vsel %vm978_vm6, %v1231_v51, %v5059_v55 }
 0x2ab   : > { %v1960_v17 = vsel %vm986_vm10, %v1959_v52, %v5127_v59  ;;  %v1486_v59 = vsel %vm978_vm6, %v1485_v40, %v5072_v16  ;;  %v1233_v52 = vsel %vm980_vm7, %v1232_v44, %v1185_v24 }
 0x2ac   : > { %v1961_v38 = vsel %vm988_vm11, %v1960_v17, %v1925_v6  ;;  %v1487_v17 = vsel %vm980_vm7, %v1486_v59, %v1439_v7  ;;  %v1234_v53 = vsel %vm982_vm8, %v1233_v52, %v5109_v29 }
 0x2ad   : > { %1969 = vst [vmem:[#allocation3 + $0x48] sm:$0xf] %v1961_v38  ;;  %v2619_v46 = vpop.permute.xlu0 %2618  ;;  %v2173_v10 = vpop.permute.xlu1 %2172 }
 0x2ae   : > { %v2209_v21 = vsel %vm988_vm11, %v2208_v39, %v2173_v10  ;;  %v1488_v39 = vsel %vm982_vm8, %v1487_v17, %v5119_v35  ;;  %v2673_v44 = vsel %vm976_vm5, %v4977_v11, %v2619_v46 }
 0x2af   : > { %v2219_v63 = vrot.slane %v2209_v21, 4 }
 0x2b1   : > { %2223 = vst [vmem:[#allocation3 + $0x48] sm:$0xf0] %v2219_v63  ;;  %v2873_v6 = vpop.permute.xlu0 %2872  ;;  %v1193_v58 = vpop.permute.xlu1 %1192 }
 0x2b2   : > { %v1235_v55 = vsel %vm984_vm9, %v1234_v53, %v1193_v58 }
 0x2b3   : > { %v1236_v7 = vsel %vm986_vm10, %v1235_v55, %v5146_v62 }
 0x2b5   : > { %v2177_v9 = vpop.permute.xlu0 %2176  ;;  %v1447_v38 = vpop.permute.xlu1 %1446 }
 0x2b6   : > { %v1489_v10 = vsel %vm984_vm9, %v1488_v39, %v1447_v38 }
 0x2b7   : > { %v1490_v63 = vsel %vm986_vm10, %v1489_v10, %v5156_v56  ;;  %v2674_v56 = vsel %vm978_vm6, %v2673_v44, %v5107_v14 }
 0x2b8   : > { %v1491_v16 = vsel %vm988_vm11, %v1490_v63, %v1455_v4 }
 0x2b9   : > { %1499 = vst [vmem:[#allocation3 + $0x18] sm:$0xf] %v1491_v16  ;;  %v2627_v24 = vpop.permute.xlu0 %2626  ;;  %v1201_v29 = vpop.permute.xlu1 %1200 }
 0x2ba   : > { %v1237_v57 = vsel %vm988_vm11, %v1236_v7, %v1201_v29  ;;  %v2675_v58 = vsel %vm980_vm7, %v2674_v56, %v2627_v24  ;;  %v2210_v29 = vsel %vm976_vm5, %v5006_v50, %v2177_v9 }
 0x2bb   : > { %v1247_v51 = vrot.slane %v1237_v57, 4  ;;  %v2676_v62 = vsel %vm982_vm8, %v2675_v58, %v5144_v45  ;;  %v2680_v45 = vsel %vm976_vm5, %v4958_v15, %v2647_v19 }
 0x2bc   : > { %v2681_v57 = vsel %vm978_vm6, %v2680_v45, %v5164_v36 }
 0x2bd   : > { %1251 = vst [vmem:[#allocation3 + $0x30] sm:$0xf0] %v1247_v51  ;;  %v2881_v35 = vpop.permute.xlu0 %2880  ;;  %v2901_v22 = vpop.permute.xlu1 %2900  ;;  %v2211_v51 = vsel %vm978_vm6, %v2210_v29, %v5184_v28 }
 0x2be   : > { %v2934_v56 = vsel %vm976_vm5, %v5039_v27, %v2901_v22 }
 0x2bf   : > { %v2935_v28 = vsel %vm978_vm6, %v2934_v56, %v5172_v37 }
 0x2c1   : > { %v2635_v40 = vpop.permute.xlu0 %2634  ;;  %v2655_v21 = vpop.permute.xlu1 %2654 }
 0x2c2   : > { %v2677_v53 = vsel %vm984_vm9, %v2676_v62, %v2635_v40  ;;  %v2682_v58 = vsel %vm980_vm7, %v2681_v57, %v2655_v21 }
 0x2c3   : > { %v2678_v39 = vsel %vm986_vm10, %v2677_v53, %v5182_v60  ;;  %v2683_v19 = vsel %vm982_vm8, %v2682_v58, %v5194_v5 }
 0x2c5   : > { %v2889_v4 = vpop.permute.xlu0 %2888  ;;  %v2909_v59 = vpop.permute.xlu1 %2908 }
 0x2c6   : > { %v2936_v21 = vsel %vm980_vm7, %v2935_v28, %v2909_v59  ;;  %v5675_v28 = vld [vmem:[#allocation42_spill] sm:$0xff] }
 0x2c9   : > { %v1205_v52 = vpop.permute.xlu0 %1204  ;;  %v1929_v17 = vpop.permute.xlu1 %1928 }
 0x2ca   : > { %v1962_v60 = vsel %vm976_vm5, %v5095_v42, %v1929_v17  ;;  %v2927_v42 = vsel %vm976_vm5, %v4994_v0, %v2873_v6  ;;  %v2937_v17 = vsel %vm982_vm8, %v2936_v21, %v5202_v49 }
 0x2cb   : > { %v1963_v50 = vsel %vm978_vm6, %v1962_v60, %v5214_v18  ;;  %v1238_v18 = vsel %vm976_vm5, %v5089_v33, %v1205_v52  ;;  %v2928_v37 = vsel %vm978_vm6, %v2927_v42, %v5117_v41 }
 0x2cc   : > { %v1239_v52 = vsel %vm978_vm6, %v1238_v18, %v5248_v31 }
 0x2cd   : > { %v2643_v38 = vpop.permute.xlu0 %2642  ;;  %v2185_v55 = vpop.permute.xlu1 %2184 }
 0x2ce   : > { %v2679_v11 = vsel %vm988_vm11, %v2678_v39, %v2643_v38  ;;  %v2212_v15 = vsel %vm980_vm7, %v2211_v51, %v2185_v55 }
 0x2cf   : > { %v2689_v46 = vrot.slane %v2679_v11, 4  ;;  %v2213_v27 = vsel %vm982_vm8, %v2212_v15, %v5226_v1  ;;  %v2929_v1 = vsel %vm980_vm7, %v2928_v37, %v2881_v35  ;;  %v2945_v37 = vld [vmem:[#allocation3 + $0x18] sm:$0xff] }
 0x2d0   : > { %v2930_v49 = vsel %vm982_vm8, %v2929_v1, %v5154_v34 }
 0x2d1   : > { %2693 = vst [vmem:[#allocation3 + $0x8] sm:$0xf0] %v2689_v46  ;;  %v1213_v14 = vpop.permute.xlu0 %1212  ;;  %v2663_v10 = vpop.permute.xlu1 %2662  ;;  %v2931_v11 = vsel %vm984_vm9, %v2930_v49, %v2889_v4 }
 0x2d2   : > { %v2684_v0 = vsel %vm984_vm9, %v2683_v19, %v2663_v10 }
 0x2d5   : > { %v1467_v63 = vpop.permute.xlu0 %1466  ;;  %v2917_v16 = vpop.permute.xlu1 %2916 }
 0x2d6   : > { %v2938_v35 = vsel %vm984_vm9, %v2937_v17, %v2917_v16 }
 0x2d7   : > { %v2939_v10 = vsel %vm986_vm10, %v2938_v35, %v5244_v8 }
 0x2d8   : > { %v2949_v18 = vld [vmem:[#allocation3 + $0x8] sm:$0xff] }
 0x2d9   : > { %v1945_v24 = vpop.permute.xlu0 %1944  ;;  %v1459_v7 = vpop.permute.xlu1 %1458 }
 0x2da   : > { %v1492_v59 = vsel %vm976_vm5, %v5137_v12, %v1459_v7 }
 0x2db   : > { %v1493_v31 = vsel %vm978_vm6, %v1492_v59, %v5252_v20  ;;  %v3043_v59 = vld [vmem:[%s5677_s3] sm:$0xff]  ;;  %s3575_s3 = scalar_lea.vmem %s3574_s17, 512 }
 0x2dd   : > { %v2201_v40 = vpop.permute.xlu0 %2200  ;;  %v1937_v44 = vpop.permute.xlu1 %1936 }
 0x2de   : > { %v1964_v36 = vsel %vm980_vm7, %v1963_v50, %v1937_v44  ;;  %v5674_v50 = vld [vmem:[#allocation38_spill] sm:$0xff] }
 0x2df   : > { %v1965_v5 = vsel %vm982_vm8, %v1964_v36, %v5256_v32  ;;  %v2685_v32 = vsel %vm986_vm10, %v2684_v0, %v5234_v47  ;;  %v2947_v0 = vld [vmem:[#allocation3 + $0x48] sm:$0xff] }
 0x2e0   : > { %v1966_v38 = vsel %vm984_vm9, %v1965_v5, %v1945_v24  ;;  %v1494_v24 = vsel %vm980_vm7, %v1493_v31, %v1467_v63  ;;  %v2932_v63 = vsel %vm986_vm10, %v2931_v11, %v5192_v30  ;;  %v2953_v5 = vld [vmem:[%s5676_s2] sm:$0xff]  ;;  %s3569_s2 = scalar_lea.vmem %s3240_s26, 256 }
 0x2e1   : > { %v1221_v9 = vpop.permute.xlu0 %1220  ;;  %v2193_v22 = vpop.permute.xlu1 %2192  ;;  %p3570_p11 = scmp.ne.s32.totalorder %s3240_s26, %s3569_s2  ;;  %p3577_p1 = scmp.lt.s32.totalorder %s3575_s3, %s3569_s2 }
 0x2e2   : > { %v2214_v6 = vsel %vm984_vm9, %v2213_v27, %v2193_v22 }
 0x2e3   : > { %v2215_v62 = vsel %vm986_vm10, %v2214_v6, %v5260_v61  ;;  %v1240_v61 = vsel %vm980_vm7, %v1239_v52, %v1213_v14  ;;  %v1967_v14 = vsel %vm986_vm10, %v1966_v38, %v5250_v3  ;;  %v1495_v3 = vsel %vm982_vm8, %v1494_v24, %v5246_v26  ;;  %v3126_v52 = vld [vmem:[%s5679_s4] sm:$0xff]  ;;  %p3571_p12 = pnand %p3570_p11, %p3840_p5  ;;  %p3578_p2 = por %p3577_p1, %p3576_p0 }
 0x2e4   : > { %v2216_v33 = vsel %vm988_vm11, %v2215_v62, %v2201_v40  ;;  %v1241_v47 = vsel %vm982_vm8, %v1240_v61, %v5242_v25  ;;  %v5672_v25 = vld [vmem:[#allocation17_spill] sm:$0xff]  ;;  %v5673_v40 = vld [vmem:[#allocation34_spill] sm:$0xff] }
 0x2e5   : > { %v2220_v41 = vrot.slane %v2216_v33, 4  ;;  %v1475_v53 = vpop.permute.xlu0 %1474  ;;  %v2671_v39 = vpop.permute.xlu1 %2670  ;;  %v1242_v20 = vsel %vm984_vm9, %v1241_v47, %v1221_v9  ;;  %v977_v7 = vsel %vm976_vm5, %v5672_v25, %v4909_v2  ;;  %v5678_v33 = vmov 0.0   ;;  %p3572_p13 = pneg %p3571_p12 }
 0x2e6   : > { %v2686_v12 = vsel %vm988_vm11, %v2685_v32, %v2671_v39  ;;  %v1243_v8 = vsel %vm986_vm10, %v1242_v20, %v5254_v23  ;;  %v1496_v60 = vsel %vm984_vm9, %v1495_v3, %v1475_v53  ;;  %v979_v2 = vsel %vm978_vm6, %v977_v7, %v5673_v40 }
 0x2e7   : > { %2224 = vst [vmem:[#allocation3 + $0x28] sm:$0xf0] %v2220_v41  ;;  %v2690_v55 = vrot.slane %v2686_v12, 4  ;;  %v981_v26 = vsel %vm980_vm7, %v979_v2, %v4942_v48  ;;  %v1497_v30 = vsel %vm986_vm10, %v1496_v60, %v5258_v54  ;;  %v995_v54 = vsel %vm986_vm10, %v5066_v43, %v5675_v28  ;;  %p3579_p3 = pnand %p3578_p2, %p3572_p13 }
 0x2e8   : > { %v983_v42 = vsel %vm982_vm8, %v981_v26, %v5674_v50 }
 0x2e9   : > { %2694 = vst [vmem:[#allocation3 + $0x20] sm:$0xf0] %v2690_v55  ;;  %v1953_v46 = vpop.permute.xlu0 %1952  ;;  %v2925_v16 = vpop.permute.xlu1 %2924  ;;  %v985_v48 = vsel %vm984_vm9, %v983_v42, %v4967_v13 }
 0x2ea   : > { %v1968_v34 = vsel %vm988_vm11, %v1967_v14, %v1953_v46  ;;  %v2940_v4 = vsel %vm988_vm11, %v2939_v10, %v2925_v16 }
 0x2eb   : > { %1970 = vst [vmem:[#allocation3 + $0x28] sm:$0xf] %v1968_v34  ;;  %2942 = vst [vmem:[#allocation3 + $0x38] sm:$0xf] %v2940_v4 }
 0x2ed   : > { %v1229_v45 = vpop.permute.xlu0 %1228  ;;  %v2897_v29 = vpop.permute.xlu1 %2896 }
 0x2ee   : > { %v1244_v57 = vsel %vm988_vm11, %v1243_v8, %v1229_v45  ;;  %v2933_v51 = vsel %vm988_vm11, %v2932_v63, %v2897_v29 }
 0x2ef   : > { %v1248_v44 = vrot.slane %v1244_v57, 4  ;;  %2941 = vst [vmem:[#allocation3 + $0x40] sm:$0xf] %v2933_v51 }
 0x2f0   : > { %v2950_v13 = vld [vmem:[#allocation3 + $0x20] sm:$0xff] }
 0x2f1   : > { %1252 = vst [vmem:[#allocation3] sm:$0xf0] %v1248_v44  ;;  %v1483_v23 = vpop.permute.xlu0 %1482  ;;  %v942_v56 = vpop.permute.xlu1 %941 }
 0x2f2   : > { %v1498_v58 = vsel %vm988_vm11, %v1497_v30, %v1483_v23  ;;  %v2952_v15 = vld [vmem:[#allocation3 + $0x38] sm:$0xf]  ;;  %v987_v36 = vsel %vm986_vm10, %v985_v48, %v942_v56  ;;  %v2948_v43 = vld [vmem:[#allocation3 + $0x28] sm:$0xff] }
 0x2f3   : > { %1500 = vst [vmem:[#allocation3 + $0x10] sm:$0xf] %v1498_v58  ;;  %3450 = vmatprep.subr.msk.mxu1 %vm454_vm0, %v2952_v15  ;;  %3453 = vmatprep.subr.msk.mxu0 %vm454_vm0, %v2952_v15 }
 0x2f5   : > { %v974_v19 = vpop.permute.xlu0 %973  ;;  %v946_v9 = vpop.permute.xlu1 %945 }
 0x2f6   : > { %v996_v27 = vsel %vm988_vm11, %v995_v54, %v974_v19  ;;  %v989_v22 = vsel %vm988_vm11, %v987_v36, %v946_v9  ;;  %v2951_v21 = vld [vmem:[#allocation3 + $0x40] sm:$0xf] }
 0x2f7   : > { %998 = vst [vmem:[#allocation3] sm:$0xf] %v996_v27  ;;  %997 = vst [vmem:[#allocation3 + $0x30] sm:$0xf] %v989_v22  ;;  %3451 = vmatpush1.msk.msra.mxu1 %vm454_vm0, %v2951_v21  ;;  %3454 = vmatpush1.msk.msra.mxu0 %vm454_vm0, %v2951_v21 }
 0x2f8   : > { %2994 = vmatprep.subr.mxu1 %v2950_v13  ;;  %3077 = vmatprep.subr.mxu0 %v2950_v13 }
 0x2f9   : > { %2995 = vmatpush1.msra.mxu1 %v2949_v18  ;;  %3078 = vmatpush1.msra.mxu0 %v2949_v18 }
 0x2fa   : > { %2996 = vmatprep.subr.mxu1 %v2948_v43  ;;  %3079 = vmatprep.subr.mxu0 %v2948_v43  ;;  %v2946_v6 = vld [vmem:[#allocation3 + $0x10] sm:$0xff] }
 0x2fb   : > { %2997 = vmatpush1.msra.mxu1 %v2947_v0  ;;  %3080 = vmatpush1.msra.mxu0 %v2947_v0 }
 0x2fc   : > { %2998 = vmatprep.subr.mxu1 %v2946_v6  ;;  %3081 = vmatprep.subr.mxu0 %v2946_v6 }
 0x2fd   : > { %2999 = vmatpush1.msra.mxu1 %v2945_v37  ;;  %3082 = vmatpush1.msra.mxu0 %v2945_v37 }
 0x2fe   : > { %v2944_v62 = vld [vmem:[#allocation3] sm:$0xff]  ;;  %v2943_v1 = vld [vmem:[#allocation3 + $0x30] sm:$0xff] }
 0x2ff   : > { %3000 = vmatprep.subr.mxu1 %v2944_v62  ;;  %3083 = vmatprep.subr.mxu0 %v2944_v62 }
 0x300   : > { %3001 = vmatpush1.msra.mxu1 %v2943_v1  ;;  %3084 = vmatpush1.msra.mxu0 %v2943_v1 }
 0x301   : > { %3452 = vmatmul.mubr.msk.f32.vlgmr.msra.gmra.mxu1 %vm2960_vm12, %v2953_v5  ;;  %3455 = vmatmul.mubr.msk.f32.vlgmr.msra.gmra.mxu0 %vm2960_vm12, %v3043_v59 }
 0x302   : > { %3456 = vmatprep.subr.msk.mxu1 %vm454_vm0, %v2952_v15  ;;  %3200 = vmatprep.mubr.f32.mxu1 %v5678_v33 }
 0x303   : > { %3457 = vmatpush1.msk.msra.mxu1 %vm454_vm0, %v2951_v21 }
 0x304   : > { %3160 = vmatprep.subr.mxu1 %v2950_v13 }
 0x305   : > { %3161 = vmatpush1.msra.mxu1 %v2949_v18 }
 0x306   : > { %3162 = vmatprep.subr.mxu1 %v2948_v43 }
 0x307   : > { %3163 = vmatpush1.msra.mxu1 %v2947_v0 }
 0x308   : > { %3164 = vmatprep.subr.mxu1 %v2946_v6 }
 0x309   : > { %3165 = vmatpush1.msra.mxu1 %v2945_v37 }
 0x30a   : > { %3166 = vmatprep.subr.mxu1 %v2944_v62 }
 0x30b   : > { %3167 = vmatpush1.msra.mxu1 %v2943_v1 }
 0x30c   : > { %3458 = vmatmul.mubr.msk.f32.vlgmr.msra.gmra.mxu1 %vm2960_vm12, %v3126_v52 }
 0x30d   : > { %3582 = shalt.err (!%p3579_p3)
}
 0x30e   : > { %s3583_s4 = scalar_lea.hbm %s3237_s16, 256  ;;  %s3587_s0 = scalar_lea.hbm %s5543_s9, 512 }
 0x30f   : > { %p3584_p4 = scmp.ne.s32.totalorder %s3237_s16, %s3583_s4  ;;  %p3588_p9 = scmp.lt.s32.totalorder %s3237_s16, %s5543_s9 }
 0x310   : > { %p3589_p10 = scmp.lt.s32.totalorder %s3587_s0, %s3583_s4 }
 0x311   : > { %p3585_p7 = pnand %p3584_p4, %p3840_p5 }
 0x312   : > { %p3590_p11 = por %p3589_p10, %p3588_p9 }
 0x313   : > { %p3586_p8 = pneg %p3585_p7 }
 0x315   : > { %p3591_p12 = pnand %p3590_p11, %p3586_p8 }
 0x317   : > { %3594 = shalt.err (!%p3591_p12)
}
 0x318   : > { %3478 = dma.vmem_to_hbm [thread:$0]  (%p3840_p5), %s3240_s26, 256, %s3237_s16, %s3210_s1   ;;  %v2958_v17 = vpop.permute.xlu0 %2957  ;;  %v3048_v41 = vpop.permute.xlu1 %3047 }
 0x319   : > { %s3214_s2 = sand.u32 1, %s3821_s25   ;;  %s420_s3 = scalar_lea.vmem [#allocation6], %s3923_s28 }
 0x31a   : > { %s3253_s5 = sshll.u32 %s420_s3, 4  ;;  %s427_s4 = scalar_lea.vmem [#allocation8], %s3923_s28  ;;  %s5443_s5 = int_to_ptr.vmem [resolvable:$true] %s3253_s5 }
 0x31b   : > { %s3267_s6 = sshll.u32 %s427_s4, 4  ;;  %s5441_s25 = scalar_lea.hbm %s5544_s10, %s5414_s19  ;;  %s5445_s6 = int_to_ptr.vmem [resolvable:$true] %s3267_s6 }
 0x31c   : > { %s5451_s17 = scalar_lea.hbm %s5545_s11, %s5414_s19  ;;  %s5453_s20 = scalar_lea.sflag [#allocation7], %s3214_s2 }
 0x31d   : > { %s3595_s29 = scalar_lea.vmem %s5443_s5, 256  ;;  %s3732_s0 = smov [#allocation6]  }
 0x31e   : > { %p3596_p13 = scmp.ne.s32.totalorder %s5443_s5, %s3595_s29  ;;  %s3599_s1 = sshll.u32 %s3732_s0, 4  ;;  %s3600_s1 = int_to_ptr.vmem [resolvable:$false] %s3599_s1 }
 0x31f   : > { %s3601_s16 = scalar_lea.vmem %s3600_s1, 512  ;;  %p3602_p2 = scmp.lt.s32.totalorder %s5443_s5, %s3600_s1 }
 0x320   : > { %p3597_p0 = pnand %p3596_p13, %p3840_p5  ;;  %p3603_p3 = scmp.lt.s32.totalorder %s3601_s16, %s3595_s29 }
 0x322   : > { %p3598_p1 = pneg %p3597_p0  ;;  %p3604_p4 = por %p3603_p3, %p3602_p2 }
 0x324   : > { %p3605_p7 = pnand %p3604_p4, %p3598_p1 }
 0x3c1   : > { %v3036_v53 = vpop.f32.mrf.mxu1  ;;  %v3119_v32 = vpop.f32.mrf.mxu0 }
 0x3c2   : > { %v3120_v39 = vadd.f32 %v3119_v32, %v3048_v41  ;;  %v3037_v61 = vadd.f32 %v3036_v53, %v2958_v17 }
 0x3c3   : > { %v3038_v35 = vpop.f32.mrf.mxu1  ;;  %v3121_v12 = vpop.f32.mrf.mxu0 }
 0x3c4   : > { %3124 = vst [vmem:[%s427_s4] sm:$0xff] %v3120_v39  ;;  %3041 = vst [vmem:[%s420_s3] sm:$0xff] %v3037_v61  ;;  %v3039_v38 = vadd.f32 %v3038_v35, %v2958_v17  ;;  %v3122_v31 = vadd.f32 %v3121_v12, %v3048_v41 }
 0x3c6   : > { %3042 = vst [vmem:[%s420_s3 + $0x8] sm:$0xff] %v3039_v38  ;;  %3125 = vst [vmem:[%s427_s4 + $0x8] sm:$0xff] %v3122_v31 }
 0x3c7   : > { %3608 = shalt.err (!%p3605_p7)
}
 0x3c8   : > { %s3609_s2 = scalar_lea.hbm %s5441_s25, 256  ;;  %s3613_s26 = scalar_lea.hbm %s5544_s10, 512 }
 0x3c9   : > { %p3610_p8 = scmp.ne.s32.totalorder %s5441_s25, %s3609_s2  ;;  %p3614_p11 = scmp.lt.s32.totalorder %s5441_s25, %s5544_s10 }
 0x3ca   : > { %p3615_p12 = scmp.lt.s32.totalorder %s3613_s26, %s3609_s2 }
 0x3cb   : > { %p3611_p9 = pnand %p3610_p8, %p3840_p5 }
 0x3cc   : > { %p3616_p13 = por %p3615_p12, %p3614_p11 }
 0x3cd   : > { %p3612_p10 = pneg %p3611_p9 }
 0x3cf   : > { %p3617_p0 = pnand %p3616_p13, %p3612_p10 }
 0x3d1   : > { %3620 = shalt.err (!%p3617_p0)
}
 0x3d2   : > { %3479 = dma.vmem_to_hbm [thread:$0]  (%p3840_p5), %s5443_s5, 256, %s5441_s25, %s5453_s20  }
 0x3d3   : > { %s3621_s29 = scalar_lea.vmem %s5445_s6, 256  ;;  %s3733_s1 = smov [#allocation8]  }
 0x3d4   : > { %p3622_p1 = scmp.ne.s32.totalorder %s5445_s6, %s3621_s29  ;;  %s3625_s16 = sshll.u32 %s3733_s1, 4  ;;  %s3626_s16 = int_to_ptr.vmem [resolvable:$false] %s3625_s16 }
 0x3d5   : > { %s3627_s2 = scalar_lea.vmem %s3626_s16, 512  ;;  %p3628_p4 = scmp.lt.s32.totalorder %s5445_s6, %s3626_s16 }
 0x3d6   : > { %p3623_p2 = pnand %p3622_p1, %p3840_p5  ;;  %p3629_p7 = scmp.lt.s32.totalorder %s3627_s2, %s3621_s29 }
 0x3d8   : > { %p3624_p3 = pneg %p3623_p2  ;;  %p3630_p8 = por %p3629_p7, %p3628_p4 }
 0x3da   : > { %p3631_p9 = pnand %p3630_p8, %p3624_p3 }
 0x3dc   : > { %3634 = shalt.err (!%p3631_p9)
}
 0x3dd   : > { %s3635_s3 = scalar_lea.hbm %s5451_s17, 256  ;;  %s3639_s4 = scalar_lea.hbm %s5545_s11, 512 }
 0x3de   : > { %p3636_p10 = scmp.ne.s32.totalorder %s5451_s17, %s3635_s3  ;;  %p3640_p13 = scmp.lt.s32.totalorder %s5451_s17, %s5545_s11 }
 0x3df   : > { %p3641_p0 = scmp.lt.s32.totalorder %s3639_s4, %s3635_s3 }
 0x3e0   : > { %p3637_p11 = pnand %p3636_p10, %p3840_p5 }
 0x3e1   : > { %p3642_p1 = por %p3641_p0, %p3640_p13 }
 0x3e2   : > { %p3638_p12 = pneg %p3637_p11 }
 0x3e4   : > { %p3643_p2 = pnand %p3642_p1, %p3638_p12 }
 0x3e6   : > { %3646 = shalt.err (!%p3643_p2)
}
 0x3e7   : > { %3480 = dma.vmem_to_hbm [thread:$0]  (%p3840_p5), %s5445_s6, 256, %s5451_s17, %s5453_s20   ;;  %v3131_v55 = vpop.permute.xlu1 %3130  ;;  %v3202_v49 = vpop.f32.mrf.mxu1 }
 0x3e8   : > { %s434_s0 = scalar_lea.vmem [#allocation9], %s3923_s28  ;;  %v3203_v11 = vadd.f32 %v3202_v49, %v3131_v55  ;;  %s3279_s2 = scalar_lea.hbm %s5546_s12, %s5414_s19 }
 0x3e9   : > { %s3281_s29 = sshll.u32 %s434_s0, 4  ;;  %v3204_v47 = vpop.f32.mrf.mxu1  ;;  %s3225_s3 = scalar_lea.sflag [#allocation10], %s3920_s15  ;;  %s3282_s29 = int_to_ptr.vmem [resolvable:$true] %s3281_s29 }
 0x3ea   : > { %3207 = vst [vmem:[%s434_s0] sm:$0xff] %v3203_v11  ;;  %v3205_v46 = vadd.f32 %v3204_v47, %v3131_v55  ;;  %s3647_s5 = scalar_lea.vmem %s3282_s29, 256  ;;  %s3734_s6 = smov [#allocation9]  }
 0x3eb   : > { %p3648_p3 = scmp.ne.s32.totalorder %s3282_s29, %s3647_s5  ;;  %s3651_s17 = sshll.u32 %s3734_s6, 4  ;;  %s3652_s17 = int_to_ptr.vmem [resolvable:$false] %s3651_s17 }
 0x3ec   : > { %3208 = vst [vmem:[%s434_s0 + $0x8] sm:$0xff] %v3205_v46  ;;  %s3653_s28 = scalar_lea.vmem %s3652_s17, 512  ;;  %p3654_p8 = scmp.lt.s32.totalorder %s3282_s29, %s3652_s17 }
 0x3ed   : > { %p3649_p4 = pnand %p3648_p3, %p3840_p5  ;;  %p3655_p9 = scmp.lt.s32.totalorder %s3653_s28, %s3647_s5 }
 0x3ef   : > { %p3650_p7 = pneg %p3649_p4  ;;  %p3656_p10 = por %p3655_p9, %p3654_p8 }
 0x3f1   : > { %p3657_p11 = pnand %p3656_p10, %p3650_p7 }
 0x3f3   : > { %3660 = shalt.err (!%p3657_p11)
}
 0x3f4   : > { %s3661_s20 = scalar_lea.hbm %s3279_s2, 256  ;;  %s3665_s25 = scalar_lea.hbm %s5546_s12, 512 }
 0x3f5   : > { %p3662_p12 = scmp.ne.s32.totalorder %s3279_s2, %s3661_s20  ;;  %p3666_p1 = scmp.lt.s32.totalorder %s3279_s2, %s5546_s12 }
 0x3f6   : > { %p3667_p2 = scmp.lt.s32.totalorder %s3665_s25, %s3661_s20 }
 0x3f7   : > { %p3663_p13 = pnand %p3662_p12, %p3840_p5 }
 0x3f8   : > { %p3668_p3 = por %p3667_p2, %p3666_p1 }
 0x3f9   : > { %p3664_p0 = pneg %p3663_p13 }
 0x3fb   : > { %p3669_p4 = pnand %p3668_p3, %p3664_p0 }
 0x3fd   : > { %3672 = shalt.err (!%p3669_p4)
}
 0x3fe   : > { %3481 = dma.vmem_to_hbm [thread:$0]  (%p3840_p5), %s3282_s29, 256, %s3279_s2, %s3225_s3  }
 0x3ff PF: > { %p3499_p7 = scmp.ge.s32.totalorder %s3715_s24, 2  ;;  %s3293_s18 = sand.u32 1, %s3703_s21  }
 0x400   : > { %s3294_s0 = scalar_lea.sflag [#allocation5], %s3293_s18 }
 0x401   : > { %p3487_p8 = pnand %p3499_p7, %p3844_p6 }
 0x403   : > { %p3488_p9 = pneg %p3487_p8 }
 0x405   : > { %3690 = dma.done.wait (%p3488_p9), %s3294_s0, 256  }
 0x406   : > { %3692 = vsyncadd (%p3488_p9), %s3294_s0, 4294967040  ;;  %s5680_s1 = sadd.s32 4294967294, %s3715_s24  }
 0x407   : > { %s3302_s16 = sand.u32 1, %s5680_s1  }
 0x408   : > { %s3303_s5 = scalar_lea.sflag [#allocation7], %s3302_s16 }
 0x409   : > { %3694 = dma.done.wait (%p3488_p9), %s3303_s5, 512  }
 0x40a   : > { %3696 = vsyncadd (%p3488_p9), %s3303_s5, 4294966784  ;;  %s3321_s13 = scalar_lea.sflag [#allocation10], %s3293_s18 }
 0x40b   : > { %3698 = dma.done.wait (%p3488_p9), %s3321_s13, 256  }
 0x40c   : > { %3700 = vsyncadd (%p3488_p9), %s3321_s13, 4294967040  ;;  %p29_p5 = scmp.ge.s32.totalorder %s3825_s27, 4   ;;  %s5681_s21 = smov %s3707_s22 }
 0x40d   : > { %s5682_s22 = smov %s3711_s23  ;;  %s5683_s23 = smov %s3838_s30 }
 0x40e   : > { %s5684_s24 = smov %s3825_s27  ;;  %31 = sbr.rel (!%p29_p5) target bundleno = 15 (0xf), region = 140 }
 0x413   :  { %3326 = vsyncpa [#allocation5], 1 }
 0x414   :  { %3328 = vsyncpa [#allocation5 + $0x1], 1 }
 0x415   :  { %3329 = vsyncpa [#allocation7], 1 }
 0x416   :  { %3331 = vsyncpa [#allocation7 + $0x1], 1 }
 0x417   :  { %3332 = vsyncpa [#allocation10], 1 }
 0x418   :  { %3334 = vsyncpa [#allocation10 + $0x1], 1 }

</bundles_post_ra>
